<compile_context>
chip_gen: v7x
topology: tpu7x:2x2x1
jax: 0.10.0
libtpu: 0.0.40
codegen_flags: <defaults>
</compile_context>

<pallas_src>
import functools

import jax
import jax.numpy as jnp
from jax import lax
from jax.experimental import pallas as pl
from jax.experimental.pallas import tpu as pltpu

VOCAB_ALIGN = 128          # pad V up to a multiple of the lane width / MXU K tile
MAX_TOK_BLOCK = 1024       # upper bound on tokens per grid step
MIN_TOK_BLOCK = 256        # lower bound (fills MXU M dim, amortizes grid overhead)
ONE_HOT_BUDGET = 4 << 20   # cap on the in-kernel (T, Vp) f32 one-hot bytes


def _round_up(x, m):
    return ((x + m - 1) // m) * m


def _vmem_capacity_bytes():
    # Physical per-core VMEM; conservative fallback = 64 MiB (v7x per-TC).
    try:
        info = pltpu.get_tpu_info()
        cap = getattr(info, "vmem_capacity_bytes", None)
        if cap:
            return int(cap)
    except Exception:
        pass
    return 64 << 20


_VMEM_CAPACITY = _vmem_capacity_bytes()


def _supports_single_buffer():
    # Import-time feature check (constructor signature only) for
    # pipeline_mode=pl.Buffered -- replaces the old broad runtime try/except.
    if not hasattr(pl, "Buffered"):
        return False
    try:
        pl.BlockSpec((8, 128), lambda i: (0, 0), pipeline_mode=pl.Buffered(1))
    except Exception:
        return False
    return True


_SINGLE_BUFFER_OK = _supports_single_buffer()


def _pick_tok_block(v_pad):
    # Largest multiple of MIN_TOK_BLOCK <= MAX_TOK_BLOCK keeping the (T, Vp)
    # f32 one-hot under ONE_HOT_BUDGET bytes.
    by_budget = ONE_HOT_BUDGET // (v_pad * 4)
    tb = (by_budget // MIN_TOK_BLOCK) * MIN_TOK_BLOCK
    return max(MIN_TOK_BLOCK, min(MAX_TOK_BLOCK, tb))


def _embedding_kernel(idx_ref, table_ref, out_ref):
    # idx_ref   : (T, 1)  int32   -- token indices for this block
    # table_ref : (Vp, D) float32 -- full padded table (grid-invariant)
    # out_ref   : (T, D)  float32
    ids = idx_ref[...]                                       # (T, 1)
    t = ids.shape[0]
    vp = table_ref.shape[0]
    # (T, Vp) one-hot, vocab axis on lanes -> MXU-canonical, no transpose.
    iota = lax.broadcasted_iota(jnp.int32, (t, vp), 1)
    onehot = (ids == iota).astype(table_ref.dtype)           # (T, Vp)
    # Exact row gather: each row has a single 1.0; HIGHEST precision keeps the
    # f32 table values un-truncated through the MXU.
    out_ref[...] = lax.dot_general(
        onehot, table_ref[...],
        dimension_numbers=(((1,), (0,)), ((), ())),
        preferred_element_type=jnp.float32,
        precision=lax.Precision.HIGHEST,
    ).astype(out_ref.dtype)


@functools.partial(jax.jit, static_argnames=("tok_block", "single_buffer_table"))
def _forward_impl(x, table_padded, tok_block, single_buffer_table):
    v_pad, d = table_padded.shape
    orig_shape = x.shape

    idx = x.reshape(-1).astype(jnp.int32)
    n = idx.shape[0]
    n_pad = _round_up(max(n, 1), tok_block)
    if n_pad != n:
        idx = jnp.pad(idx, (0, n_pad - n))          # pad with index 0; sliced off
    idx_col = idx.reshape(n_pad, 1)

    grid = (n_pad // tok_block,)

    table_spec_kwargs = {}
    table_bufs = 2
    if single_buffer_table:
        # Constant index_map -> fetched once; don't pay 2x VMEM for it.
        table_spec_kwargs = dict(pipeline_mode=pl.Buffered(1))
        table_bufs = 1

    # Always set a VMEM budget (v5e scoped default is only 16 MiB), clamped to
    # physical capacity minus headroom so the request is valid on v7x (64 MiB).
    one_hot_bytes = tok_block * v_pad * 4
    est_vmem = (
        v_pad * d * 4 * table_bufs          # resident table buffer(s)
        + 2 * tok_block * d * 4             # double-buffered output blocks
        + 2 * tok_block * 512               # (T, 1) index columns, lane-padded layout
        + 3 * one_hot_bytes                 # iota + compare + f32 one-hot live values
    )
    vmem_limit = max(est_vmem * 3 // 2, 32 << 20)
    vmem_limit = min(vmem_limit, _VMEM_CAPACITY - (8 << 20))

    out = pl.pallas_call(
        _embedding_kernel,
        out_shape=jax.ShapeDtypeStruct((n_pad, d), table_padded.dtype),
        grid_spec=pltpu.PrefetchScalarGridSpec(
            num_scalar_prefetch=0,
            grid=grid,
            in_specs=[
                pl.BlockSpec((tok_block, 1), lambda i: (i, 0)),
                pl.BlockSpec((v_pad, d), lambda i: (0, 0), **table_spec_kwargs),
            ],
            out_specs=pl.BlockSpec((tok_block, d), lambda i: (i, 0)),
        ),
        compiler_params=pltpu.CompilerParams(
            # TODO(synk): use pltpu.CORE_PARALLEL (or an explicit leading core
            # axis) for 2-TC sharding on v7x once the grid has >= 2 steps.
            dimension_semantics=("parallel",),
            vmem_limit_bytes=int(vmem_limit),
        ),
    )(idx_col, table_padded)

    return out[:n].reshape(orig_shape + (d,))


class LearnedEmbeddingPallas:
    """Forward-only mirror of the PyTorch LearnedEmbedding module."""

    def __init__(self, codebook_size, dim=128, key=None):
        if key is None:
            key = jax.random.PRNGKey(0)
        # nn.Embedding default init: N(0, 1), shape (codebook_size + 1, dim)
        self.weight = jax.random.normal(
            key, (codebook_size + 1, dim), dtype=jnp.float32
        )
        self.dim = dim

        v = codebook_size + 1
        v_pad = _round_up(v, VOCAB_ALIGN)
        # Table padding hoisted out of the forward path (zero rows; valid
        # indices never hit them, so the gather result is unchanged).
        self._table_padded = (
            self.weight if v_pad == v
            else jnp.pad(self.weight, ((0, v_pad - v), (0, 0)))
        )
        self._tok_block = _pick_tok_block(v_pad)
        # Single-buffer the grid-invariant table only when double-buffering it
        # would actually cost noticeable VMEM; tiny tables use the default path.
        self._single_buffer_table = bool(
            _SINGLE_BUFFER_OK and v_pad * dim * 4 > (1 << 20)
        )

    def __call__(self, x):
        x = jnp.asarray(x)
        n = max(int(x.size), 1)
        # Don't inflate tiny batches to the full block size.
        tok_block = min(self._tok_block, _round_up(n, MIN_TOK_BLOCK))
        return _forward_impl(
            x, self._table_padded,
            tok_block=tok_block,
            single_buffer_table=self._single_buffer_table,
        )


if __name__ == "__main__":
    key = jax.random.PRNGKey(0)
    k_w, k_x = jax.random.split(key)

    codebook_size = 16   # table has codebook_size + 1 = 17 rows
    dim = 128            # module default
    batch, seq = 2, 8

    module = LearnedEmbeddingPallas(codebook_size, dim=dim, key=k_w)

    # integer indices in [0, codebook_size] (inclusive, matching the +1 row)
    x = jax.random.randint(k_x, (batch, seq), 0, codebook_size + 1,
                           dtype=jnp.int32)

    out = jax.block_until_ready(module(x))

    # reference check against plain JAX gather
    ref = jnp.take(module.weight, x, axis=0)
    assert out.shape == (batch, seq, dim), out.shape
    assert jnp.allclose(out, ref, atol=1e-6), "mismatch vs reference gather"

    print("KERNEL_OK")
</pallas_src>

<mosaic_0001>
module attributes {stable_mosaic.version = 11 : i64} {
  func.func @_embedding_kernel(%arg0: i32, %arg1: memref<256x1xi32, #tpu.memory_space<vmem>>, %arg2: memref<128x128xf32, #tpu.memory_space<vmem>>, %arg3: memref<256x128xf32, #tpu.memory_space<vmem>>) attributes {dimension_semantics = [#tpu.dimension_semantics<parallel>], iteration_bounds = array<i64: 1>, scalar_prefetch = 0 : i64, scratch_operands = 0 : i64, tpu.core_type = #tpu.core_type<tc>, window_params = [{transform_indices = @transform_0, window_bounds = array<i64: 256, 1>}, {pipeline_mode = #tpu.pipeline_mode<synchronous>, transform_indices = @transform_1, window_bounds = array<i64: 128, 128>}, {transform_indices = @transform_2, window_bounds = array<i64: 256, 128>}]} {
    %c0 = arith.constant 0 : index
    %c0_0 = arith.constant 0 : index
    %0 = vector.load %arg1[%c0, %c0_0] : memref<256x1xi32, #tpu.memory_space<vmem>>, vector<256x1xi32>
    %1 = tpu.iota {dimensions = array<i32: 1>} : vector<256x128xi32>
    %2 = vector.broadcast %0 : vector<256x1xi32> to vector<256x128xi32>
    %3 = arith.cmpi eq, %2, %1 : vector<256x128xi32>
    %4 = arith.extui %3 : vector<256x128xi1> to vector<256x128xi32>
    %5 = arith.sitofp %4 : vector<256x128xi32> to vector<256x128xf32>
    %c0_1 = arith.constant 0 : index
    %c0_2 = arith.constant 0 : index
    %6 = vector.load %arg2[%c0_1, %c0_2] : memref<128x128xf32, #tpu.memory_space<vmem>>, vector<128x128xf32>
    %cst = arith.constant dense<0.000000e+00> : vector<256x128xf32>
    %7 = tpu.matmul %5, %6, %cst {dimension_numbers = #tpu.dot_dimension_numbers<[1], [0], [0], [1], [0, 0, 1, 1], [], []>, precision = #tpu.contract_precision<fp32>} : vector<256x128xf32>, vector<128x128xf32>, vector<256x128xf32> -> vector<256x128xf32>
    %c0_3 = arith.constant 0 : index
    %c0_4 = arith.constant 0 : index
    %8 = vector.load %arg3[%c0_3, %c0_4] : memref<256x128xf32, #tpu.memory_space<vmem>>, vector<256x128xf32>
    tpu.vector_store %arg3[%c0_3, %c0_4], %7 {strides = array<i32>} : memref<256x128xf32, #tpu.memory_space<vmem>>, vector<256x128xf32>,
    return
  }
  func.func @transform_0(%arg0: i32) -> (i32, i32) {
    %c0_i32 = arith.constant 0 : i32
    %c0_i32_0 = arith.constant 0 : i32
    return %arg0, %c0_i32 : i32, i32
  }
  func.func @transform_1(%arg0: i32) -> (i32, i32) {
    %c0_i32 = arith.constant 0 : i32
    %c0_i32_0 = arith.constant 0 : i32
    %c0_i32_1 = arith.constant 0 : i32
    return %c0_i32, %c0_i32_0 : i32, i32
  }
  func.func @transform_2(%arg0: i32) -> (i32, i32) {
    %c0_i32 = arith.constant 0 : i32
    %c0_i32_0 = arith.constant 0 : i32
    return %arg0, %c0_i32 : i32, i32
  }
}

</mosaic_0001>

<bundles_post_ra>
// kernel: _forward_impl.1
= control target key start
LH: loop header
LB: loop body
LE: loop exit
PB: predicated region body
PF: predicated region fallthrough
CT: control target
= control target key end

     0   :  { %v3516_v0 = vmov 0   ;;  %s4872_s0 = inlined_call_operand.vmem [shape: s32[256,1], index: 0, kind: input, shape index: {}]   ;;  %s4873_s1 = inlined_call_operand.vmem [shape: f32[128,128], index: 1, kind: input, shape index: {}]   ;;  %s4874_s2 = inlined_call_operand.vmem [shape: f32[256,128], index: 2, kind: output, shape index: {}]  }
   0x1   :  { %3515 = vset.pattern.permute.xlu1 %v3516_v0  ;;  %3514 = vset.pattern.permute.xlu0 %v3516_v0  ;;  %v13_v1 = vld [vmem:[%s4872_s0 + $0x10] sm:$0xff]  ;;  %v11_v2 = vld [vmem:[%s4872_s0] sm:$0xff]  ;;  %v14_v3 = vld [vmem:[%s4872_s0 + $0x18] sm:$0xff] }
   0x2   :  { %52 = vperm.xlu1 %3515, %v13_v1   ;;  %46 = vperm.xlu0 %3514, %v11_v2   ;;  %v12_v4 = vld [vmem:[%s4872_s0 + $0x8] sm:$0xff]  ;;  %v15_v6 = vld [vmem:[%s4872_s0 + $0x20] sm:$0xff]  ;;  %v18_v7 = vld [vmem:[%s4872_s0 + $0x38] sm:$0xff] }
   0x3   :  { %v16_v5 = vld [vmem:[%s4872_s0 + $0x28] sm:$0xff]  ;;  %v17_v8 = vld [vmem:[%s4872_s0 + $0x30] sm:$0xff]  ;;  %v237_v9 = vld [vmem:[%s4873_s1] sm:$0xff] }
   0x4   :  { %v238_v10 = vld [vmem:[%s4873_s1 + $0x8] sm:$0xff]  ;;  %v254_v11 = vand.u32 4294901760, %v237_v9  ;;  %v239_v12 = vld [vmem:[%s4873_s1 + $0x10] sm:$0xff]  ;;  %v240_v13 = vld [vmem:[%s4873_s1 + $0x18] sm:$0xff] }
   0x5   :  { %v257_v14 = vand.u32 4294901760, %v238_v10  ;;  %v260_v15 = vand.u32 4294901760, %v239_v12  ;;  %v263_v16 = vand.u32 4294901760, %v240_v13  ;;  %v3573_v17 = vld [vmem:[%s4873_s1 + $0x20] sm:$0xff]  ;;  %v3578_v18 = vld [vmem:[%s4873_s1 + $0x28] sm:$0xff]  ;;  %v3597_v25 = vld [vmem:[%s4873_s1 + $0x30] sm:$0xff] }
   0x6   :  { %55 = vperm.xlu1 %3515, %v14_v3   ;;  %49 = vperm.xlu0 %3514, %v12_v4   ;;  %v20_v19 = vld [vmem:[%s4872_s0 + $0x48] sm:$0xff]  ;;  %v19_v20 = vld [vmem:[%s4872_s0 + $0x40] sm:$0xff]  ;;  %v266_v23 = vand.u32 4294901760, %v3573_v17  ;;  %v269_v24 = vand.u32 4294901760, %v3578_v18  ;;  %v3602_v26 = vld [vmem:[%s4873_s1 + $0x38] sm:$0xff]  ;;  %v272_v30 = vand.u32 4294901760, %v3597_v25  ;;  %v3687_v51 = vsub.f32 %v237_v9, %v254_v11 }
   0x7   :  { %v3586_v21 = vpack.c.bf16 %v257_v14, %v254_v11  ;;  %v3588_v22 = vpack.c.bf16 %v263_v16, %v260_v15  ;;  %v22_v27 = vld [vmem:[%s4872_s0 + $0x58] sm:$0xff]  ;;  %v21_v28 = vld [vmem:[%s4872_s0 + $0x50] sm:$0xff]  ;;  %v275_v31 = vand.u32 4294901760, %v3602_v26  ;;  %v3625_v32 = vld [vmem:[%s4873_s1 + $0x40] sm:$0xff]  ;;  %v3660_v41 = vsub.f32 %v239_v12, %v260_v15 }
   0x8   :  { %v3618_v29 = vpack.c.bf16 %v269_v24, %v266_v23  ;;  %v3630_v33 = vld [vmem:[%s4873_s1 + $0x48] sm:$0xff]  ;;  %v23_v35 = vld [vmem:[%s4872_s0 + $0x60] sm:$0xff]  ;;  %v278_v36 = vand.u32 4294901760, %v3625_v32  ;;  %v3645_v38 = vld [vmem:[%s4873_s1 + $0x50] sm:$0xff]  ;;  %v3662_v42 = vsub.f32 %v240_v13, %v263_v16  ;;  %v3689_v52 = vsub.f32 %v238_v10, %v257_v14 }
   0x9   :  { %3256 = vmatprep.subr.bf16.mxu0 %v3586_v21  ;;  %3160 = vmatprep.subr.bf16.mxu1 %v3586_v21  ;;  %v24_v34 = vld [vmem:[%s4872_s0 + $0x68] sm:$0xff]  ;;  %v281_v37 = vand.u32 4294901760, %v3630_v33  ;;  %v3653_v39 = vpack.c.bf16 %v275_v31, %v272_v30  ;;  %v3658_v40 = vld [vmem:[%s4873_s1 + $0x58] sm:$0xff]  ;;  %v284_v43 = vand.u32 4294901760, %v3645_v38  ;;  %v671_v44 = vand.u32 4294901760, %v3660_v41  ;;  %v25_v47 = vld [vmem:[%s4872_s0 + $0x70] sm:$0xff] }
   0xa   :  { %61 = vperm.xlu1 %3515, %v16_v5   ;;  %58 = vperm.xlu0 %3514, %v15_v6   ;;  %v678_v45 = vand.u32 4294901760, %v3662_v42  ;;  %v26_v46 = vld [vmem:[%s4872_s0 + $0x78] sm:$0xff]  ;;  %v287_v49 = vand.u32 4294901760, %v3658_v40  ;;  %v3685_v50 = vld [vmem:[%s4873_s1 + $0x60] sm:$0xff]  ;;  %v3696_v53 = vld [vmem:[%s4873_s1 + $0x68] sm:$0xff]  ;;  %v657_v1 = vand.u32 4294901760, %v3687_v51  ;;  %v3737_v5 = vsub.f32 %v3573_v17, %v266_v23 }
   0xb   :  { %3258 = vmatpush3.bf16.msra.mxu0 %v3586_v21  ;;  %3162 = vmatpush3.bf16.msra.mxu1 %v3586_v21  ;;  %v3679_v48 = vpack.c.bf16 %v281_v37, %v278_v36  ;;  %v672_v54 = vsub.f32 %v3660_v41, %v671_v44  ;;  %v290_v57 = vand.u32 4294901760, %v3685_v50  ;;  %v28_v60 = vld [vmem:[%s4872_s0 + $0x88] sm:$0xff]  ;;  %v27_v61 = vld [vmem:[%s4872_s0 + $0x80] sm:$0xff]  ;;  %v293_v63 = vand.u32 4294901760, %v3696_v53  ;;  %v3721_v0 = vld [vmem:[%s4873_s1 + $0x70] sm:$0xff] }
   0xc   :  { %3260 = vmatprep.subr.bf16.mxu0 %v3588_v22  ;;  %3164 = vmatprep.subr.bf16.mxu1 %v3588_v22  ;;  %v679_v55 = vsub.f32 %v3662_v42, %v678_v45  ;;  %v3700_v56 = vpack.c.bf16 %v678_v45, %v671_v44  ;;  %v3715_v62 = vpack.c.bf16 %v287_v49, %v284_v43  ;;  %v664_v2 = vand.u32 4294901760, %v3689_v52  ;;  %v3730_v3 = vld [vmem:[%s4873_s1 + $0x78] sm:$0xff]  ;;  %v29_v11 = vld [vmem:[%s4872_s0 + $0x90] sm:$0xff]  ;;  %v32_v23 = vld [vmem:[%s4872_s0 + $0xa8] sm:$0xff] }
   0xd   :  { %v673_v58 = vand.u32 4294901760, %v672_v54  ;;  %v3742_v6 = vsub.f32 %v3578_v18, %v269_v24  ;;  %v30_v10 = vld [vmem:[%s4872_s0 + $0x98] sm:$0xff]  ;;  %v3759_v12 = vpack.c.bf16 %v293_v63, %v290_v57  ;;  %v299_v13 = vand.u32 4294901760, %v3730_v3  ;;  %v31_v24 = vld [vmem:[%s4872_s0 + $0xa0] sm:$0xff] }
   0xe   :  { %67 = vperm.xlu1 %3515, %v18_v7   ;;  %64 = vperm.xlu0 %3514, %v17_v8   ;;  %v680_v59 = vand.u32 4294901760, %v679_v55  ;;  %v296_v7 = vand.u32 4294901760, %v3721_v0  ;;  %v685_v8 = vand.u32 4294901760, %v3737_v5  ;;  %v658_v14 = vsub.f32 %v3687_v51, %v657_v1  ;;  %v34_v54 = vld [vmem:[%s4872_s0 + $0xb8] sm:$0xff] }
   0xf   :  { %3262 = vmatpush3.bf16.msra.mxu0 %v3588_v22  ;;  %3166 = vmatpush3.bf16.msra.mxu1 %v3588_v22  ;;  %v692_v9 = vand.u32 4294901760, %v3742_v6  ;;  %v665_v15 = vsub.f32 %v3689_v52, %v664_v2  ;;  %v3791_v44 = vsub.f32 %v3597_v25, %v272_v30  ;;  %v3796_v45 = vsub.f32 %v3602_v26, %v275_v31  ;;  %v33_v25 = vld [vmem:[%s4872_s0 + $0xb0] sm:$0xff] }
  0x10   :  { %3264 = vmatprep.subr.bf16.mxu0 %v3618_v29  ;;  %3168 = vmatprep.subr.bf16.mxu1 %v3618_v29  ;;  %v3732_v4 = vpack.c.bf16 %v680_v59, %v673_v58  ;;  %v686_v16 = vsub.f32 %v3737_v5, %v685_v8  ;;  %v3810_v30 = vpack.c.bf16 %v664_v2, %v657_v1  ;;  %v35_v1 = vld [vmem:[%s4872_s0 + $0xc0] sm:$0xff] }
  0x11   :  { %v693_v17 = vsub.f32 %v3742_v6, %v692_v9  ;;  %v3768_v18 = vpack.c.bf16 %v692_v9, %v685_v8  ;;  %v712_v8 = vsub.f32 %v3625_v32, %v278_v36  ;;  %v719_v9 = vsub.f32 %v3630_v33, %v281_v37  ;;  %v40_v36 = vld [vmem:[%s4872_s0 + $0xe8] sm:$0xff]  ;;  %v39_v37 = vld [vmem:[%s4872_s0 + $0xe0] sm:$0xff] }
  0x12   :  { %73 = vperm.xlu1 %3515, %v20_v19   ;;  %70 = vperm.xlu0 %3514, %v19_v20   ;;  %v687_v19 = vand.u32 4294901760, %v686_v16 }
  0x13   :  { %3266 = vmatpush3.bf16.msra.mxu0 %v3618_v29  ;;  %3170 = vmatpush3.bf16.msra.mxu1 %v3618_v29  ;;  %v694_v20 = vand.u32 4294901760, %v693_v17 }
  0x14   :  { %3268 = vmatprep.subr.bf16.mxu0 %v3653_v39  ;;  %3172 = vmatprep.subr.bf16.mxu1 %v3653_v39 }
  0x16   :  { %79 = vperm.xlu1 %3515, %v22_v27   ;;  %76 = vperm.xlu0 %3514, %v21_v28   ;;  %v3782_v27 = vpack.c.bf16 %v299_v13, %v296_v7  ;;  %v659_v28 = vand.u32 4294901760, %v658_v14  ;;  %v38_v14 = vld [vmem:[%s4872_s0 + $0xd8] sm:$0xff] }
  0x17   :  { %3270 = vmatpush3.bf16.msra.mxu0 %v3653_v39  ;;  %3174 = vmatpush3.bf16.msra.mxu1 %v3653_v39 }
  0x18   :  { %3272 = vmatprep.subr.bf16.mxu0 %v3679_v48  ;;  %3176 = vmatprep.subr.bf16.mxu1 %v3679_v48 }
  0x1a   :  { %85 = vperm.xlu1 %3515, %v24_v34   ;;  %82 = vperm.xlu0 %3514, %v23_v35   ;;  %v666_v34 = vand.u32 4294901760, %v665_v15  ;;  %v3786_v35 = vpack.c.bf16 %v694_v20, %v687_v19  ;;  %v37_v15 = vld [vmem:[%s4872_s0 + $0xd0] sm:$0xff] }
  0x1b   :  { %3274 = vmatpush3.bf16.msra.mxu0 %v3679_v48  ;;  %3178 = vmatpush3.bf16.msra.mxu1 %v3679_v48 }
  0x1c   :  { %3276 = vmatprep.subr.bf16.mxu0 %v3715_v62  ;;  %3180 = vmatprep.subr.bf16.mxu1 %v3715_v62  ;;  %v3808_v26 = vpack.c.bf16 %v666_v34, %v659_v28 }
  0x1e   :  { %91 = vperm.xlu1 %3515, %v26_v46   ;;  %88 = vperm.xlu0 %3514, %v25_v47   ;;  %v699_v46 = vand.u32 4294901760, %v3791_v44  ;;  %v706_v47 = vand.u32 4294901760, %v3796_v45 }
  0x1f   :  { %3278 = vmatpush3.bf16.msra.mxu0 %v3715_v62  ;;  %3182 = vmatpush3.bf16.msra.mxu1 %v3715_v62 }
  0x20   :  { %3280 = vmatprep.subr.bf16.mxu0 %v3759_v12  ;;  %3184 = vmatprep.subr.bf16.mxu1 %v3759_v12  ;;  %v700_v31 = vsub.f32 %v3791_v44, %v699_v46  ;;  %v707_v55 = vsub.f32 %v3796_v45, %v706_v47  ;;  %v3816_v58 = vpack.c.bf16 %v706_v47, %v699_v46  ;;  %v42_v46 = vld [vmem:[%s4872_s0 + $0xf8] sm:$0xff]  ;;  %v41_v47 = vld [vmem:[%s4872_s0 + $0xf0] sm:$0xff] }
  0x22   :  { %97 = vperm.xlu1 %3515, %v28_v60   ;;  %94 = vperm.xlu0 %3514, %v27_v61   ;;  %v701_v59 = vand.u32 4294901760, %v700_v31  ;;  %v708_v60 = vand.u32 4294901760, %v707_v55  ;;  %v36_v61 = vld [vmem:[%s4872_s0 + $0xc8] sm:$0xff] }
  0x23   :  { %3282 = vmatpush3.bf16.msra.mxu0 %v3759_v12  ;;  %3186 = vmatpush3.bf16.msra.mxu1 %v3759_v12 }
  0x24   :  { %3284 = vmatprep.subr.bf16.mxu0 %v3782_v27  ;;  %3188 = vmatprep.subr.bf16.mxu1 %v3782_v27  ;;  %v3828_v2 = vpack.c.bf16 %v708_v60, %v701_v59 }
  0x26   :  { %103 = vperm.xlu1 %3515, %v30_v10   ;;  %100 = vperm.xlu0 %3514, %v29_v11   ;;  %v713_v10 = vand.u32 4294901760, %v712_v8  ;;  %v720_v11 = vand.u32 4294901760, %v719_v9 }
  0x27   :  { %3286 = vmatpush3.bf16.msra.mxu0 %v3782_v27  ;;  %3190 = vmatpush3.bf16.msra.mxu1 %v3782_v27 }
  0x28   :  { %3192 = vmatprep.subr.bf16.mxu1 %v3808_v26  ;;  %3288 = vmatprep.subr.bf16.mxu0 %v3810_v30  ;;  %v714_v16 = vsub.f32 %v712_v8, %v713_v10  ;;  %v721_v17 = vsub.f32 %v719_v9, %v720_v11  ;;  %v3842_v19 = vpack.c.bf16 %v720_v11, %v713_v10 }
  0x29   :  { %v754_v11 = vsub.f32 %v3721_v0, %v296_v7  ;;  %v3890_v0 = vpack.c.bf16 %v3689_v52, %v3687_v51  ;;  %v3898_v7 = vpack.c.bf16 %v3742_v6, %v3737_v5 }
  0x2a   :  { %109 = vperm.xlu1 %3515, %v32_v23   ;;  %106 = vperm.xlu0 %3514, %v31_v24   ;;  %v715_v32 = vand.u32 4294901760, %v714_v16  ;;  %v722_v33 = vand.u32 4294901760, %v721_v17  ;;  %v726_v23 = vsub.f32 %v3645_v38, %v284_v43  ;;  %v733_v24 = vsub.f32 %v3658_v40, %v287_v49 }
  0x2b   :  { %v740_v43 = vsub.f32 %v3685_v50, %v290_v57  ;;  %v747_v49 = vsub.f32 %v3696_v53, %v293_v63  ;;  %v761_v50 = vsub.f32 %v3730_v3, %v299_v13  ;;  %v3894_v3 = vpack.c.bf16 %v3662_v42, %v3660_v41 }
  0x2c   :  { %v3850_v20 = vpack.c.bf16 %v722_v33, %v715_v32  ;;  %v727_v28 = vand.u32 4294901760, %v726_v23  ;;  %v734_v34 = vand.u32 4294901760, %v733_v24  ;;  %v3902_v13 = vpack.c.bf16 %v3796_v45, %v3791_v44 }
  0x2d   :  { %v741_v59 = vand.u32 4294901760, %v740_v43  ;;  %v748_v60 = vand.u32 4294901760, %v747_v49  ;;  %v762_v53 = vand.u32 4294901760, %v761_v50  ;;  %v4875_v42 = vmov 0.0  }
  0x2e   :  { %115 = vperm.xlu1 %3515, %v34_v54   ;;  %112 = vperm.xlu0 %3514, %v33_v25   ;;  %v728_v54 = vsub.f32 %v726_v23, %v727_v28  ;;  %v735_v25 = vsub.f32 %v733_v24, %v734_v34  ;;  %v3864_v31 = vpack.c.bf16 %v734_v34, %v727_v28 }
  0x2f   :  { %v3874_v10 = vpack.c.bf16 %v748_v60, %v741_v59  ;;  %v763_v17 = vsub.f32 %v761_v50, %v762_v53  ;;  %v3904_v28 = vpack.c.bf16 %v719_v9, %v712_v8  ;;  %v3906_v34 = vpack.c.bf16 %v733_v24, %v726_v23 }
  0x30   :  { %v729_v38 = vand.u32 4294901760, %v728_v54  ;;  %v736_v40 = vand.u32 4294901760, %v735_v25  ;;  %v3936_v23 = vpack.c.bf16 %v761_v50, %v754_v11 }
  0x32   :  { %121 = vperm.xlu1 %3515, %v36_v61   ;;  %118 = vperm.xlu0 %3514, %v35_v1   ;;  %v3872_v55 = vpack.c.bf16 %v736_v40, %v729_v38  ;;  %v742_v61 = vsub.f32 %v740_v43, %v741_v59  ;;  %v749_v1 = vsub.f32 %v747_v49, %v748_v60 }
  0x34   :  { %v743_v57 = vand.u32 4294901760, %v742_v61 }
  0x36   :  { %127 = vperm.xlu1 %3515, %v38_v14   ;;  %124 = vperm.xlu0 %3514, %v37_v15   ;;  %v750_v14 = vand.u32 4294901760, %v749_v1  ;;  %v755_v15 = vand.u32 4294901760, %v754_v11 }
  0x38   :  { %v3882_v63 = vpack.c.bf16 %v750_v14, %v743_v57  ;;  %v756_v16 = vsub.f32 %v754_v11, %v755_v15  ;;  %v3884_v32 = vpack.c.bf16 %v762_v53, %v755_v15 }
  0x3a   :  { %133 = vperm.xlu1 %3515, %v40_v36   ;;  %130 = vperm.xlu0 %3514, %v39_v37   ;;  %v757_v33 = vand.u32 4294901760, %v756_v16  ;;  %v764_v36 = vand.u32 4294901760, %v763_v17 }
  0x3c   :  { %v3886_v37 = vpack.c.bf16 %v764_v36, %v757_v33 }
  0x3e   :  { %139 = vperm.xlu1 %3515, %v42_v46   ;;  %136 = vperm.xlu0 %3514, %v41_v47   ;;  %v43_v46 = vlaneseq  ;;  %v3908_v47 = vpack.c.bf16 %v747_v49, %v740_v43 }
  0x40   :  { %v3910_v51 = vand.u32 127, %v43_v46 }
  0x81   :  { %v3912_v52 = vpop.permute.xlu1 %52  ;;  %v3914_v41 = vpop.permute.xlu0 %46 }
  0x82   :  { %vm143_vm0 = vcmp.eq.s32.totalorder %v3912_v52, %v3910_v51  ;;  %vm141_vm1 = vcmp.eq.s32.totalorder %v3914_v41, %v3910_v51 }
  0x83   :  { %v2265_v5 = vsel %vm143_vm0, 1.0, %v4875_v42  ;;  %v2263_v6 = vsel %vm141_vm1, 1.0, %v4875_v42 }
  0x84   :  { %v3928_v44 = vsub.f32 %v2265_v5, %v2265_v5  ;;  %v3930_v45 = vsub.f32 %v2263_v6, %v2263_v6 }
  0x85   :  { %v3932_v8 = vpop.permute.xlu1 %55  ;;  %v3934_v9 = vpop.permute.xlu0 %49 }
  0x86   :  { %4932 = vst [vmem:[#allocation2_spill] sm:$0xff] %v3928_v44  ;;  %4933 = vst [vmem:[#allocation3_spill] sm:$0xff] %v3930_v45  ;;  %vm144_vm2 = vcmp.eq.s32.totalorder %v3932_v8, %v3910_v51  ;;  %vm142_vm3 = vcmp.eq.s32.totalorder %v3934_v9, %v3910_v51  ;;  %v336_v24 = vand.u32 4294901760, %v3930_v45  ;;  %v356_v38 = vand.u32 4294901760, %v3928_v44 }
  0x87   :  { %v2266_v54 = vsel %vm144_vm2, 1.0, %v4875_v42  ;;  %v2264_v25 = vsel %vm142_vm3, 1.0, %v4875_v42 }
  0x88   :  { %v3952_v40 = vsub.f32 %v2266_v54, %v2266_v54  ;;  %v3954_v43 = vsub.f32 %v2264_v25, %v2264_v25  ;;  %2951 = vmatprep.mubr.f32.mxu0 %v336_v24  ;;  %v337_v49 = vsub.f32 %v3930_v45, %v336_v24  ;;  %v357_v14 = vsub.f32 %v3928_v44, %v356_v38 }
  0x89   :  { %v3957_v59 = vpop.permute.xlu1 %61  ;;  %v3959_v60 = vpop.permute.xlu0 %58 }
  0x8a   :  { %4934 = vst [vmem:[#allocation4_spill] sm:$0xff] %v3952_v40  ;;  %4935 = vst [vmem:[#allocation5_spill] sm:$0xff] %v3954_v43  ;;  %vm146_vm4 = vcmp.eq.s32.totalorder %v3957_v59, %v3910_v51  ;;  %vm145_vm5 = vcmp.eq.s32.totalorder %v3959_v60, %v3910_v51  ;;  %v338_v61 = vand.u32 4294901760, %v337_v49  ;;  %v346_v1 = vand.u32 4294901760, %v3954_v43 }
  0x8b   :  { %v2268_v11 = vsel %vm146_vm4, 1.0, %v4875_v42  ;;  %v2267_v50 = vsel %vm145_vm5, 1.0, %v4875_v42  ;;  %v366_v57 = vand.u32 4294901760, %v3952_v40  ;;  %v358_v24 = vand.u32 4294901760, %v357_v14 }
  0x8c   :  { %v3976_v15 = vsub.f32 %v2268_v11, %v2268_v11  ;;  %v3978_v53 = vsub.f32 %v2267_v50, %v2267_v50  ;;  %2711 = vmatprep.mubr.f32.mxu1 %v338_v61  ;;  %2952 = vmatmul.mubr.f32.vlgmr.msra.gmra.mrb[0].mxu0 %v346_v1  ;;  %v347_v16 = vsub.f32 %v3954_v43, %v346_v1 }
  0x8d   :  { %v3981_v17 = vpop.permute.xlu1 %67  ;;  %2954 = vmatprep.mubr.f32.mxu0 %v356_v38  ;;  %v3983_v33 = vpop.permute.xlu0 %64  ;;  %3290 = vmatpush3.bf16.msra.mxu0 %v3810_v30  ;;  %v367_v36 = vsub.f32 %v3952_v40, %v366_v57 }
  0x8e   :  { %4936 = vst [vmem:[#allocation6_spill] sm:$0xff] %v3976_v15  ;;  %4937 = vst [vmem:[#allocation7_spill] sm:$0xff] %v3978_v53  ;;  %vm148_vm6 = vcmp.eq.s32.totalorder %v3981_v17, %v3910_v51  ;;  %vm147_vm7 = vcmp.eq.s32.totalorder %v3983_v33, %v3910_v51  ;;  %v348_v46 = vand.u32 4294901760, %v347_v16  ;;  %v376_v5 = vand.u32 4294901760, %v3978_v53  ;;  %3292 = vmatprep.subr.bf16.mxu0 %v3700_v56 }
  0x8f   :  { %v2270_v6 = vsel %vm148_vm6, 1.0, %v4875_v42  ;;  %v2269_v30 = vsel %vm147_vm7, 1.0, %v4875_v42  ;;  %v386_v54 = vand.u32 4294901760, %v3976_v15  ;;  %v368_v11 = vand.u32 4294901760, %v367_v36 }
  0x90   :  { %v4002_v25 = vsub.f32 %v2270_v6, %v2270_v6  ;;  %v4004_v38 = vsub.f32 %v2269_v30, %v2269_v30  ;;  %2712 = vmatmul.mubr.f32.vlgmr.msra.gmra.mrb[0].mxu1 %v348_v46  ;;  %2955 = vmatmul.mubr.f32.gmra.mrb[2].mxu0 %v366_v57  ;;  %v377_v49 = vsub.f32 %v3978_v53, %v376_v5 }
  0x91   :  { %3194 = vmatpush3.bf16.msra.mxu1 %v3808_v26  ;;  %v4008_v61 = vpop.permute.xlu1 %73  ;;  %2714 = vmatprep.mubr.f32.mxu1 %v358_v24  ;;  %v4010_v1 = vpop.permute.xlu0 %70  ;;  %v387_v50 = vsub.f32 %v3976_v15, %v386_v54 }
  0x92   :  { %4938 = vst [vmem:[#allocation8_spill] sm:$0xff] %v4002_v25  ;;  %4939 = vst [vmem:[#allocation9_spill] sm:$0xff] %v4004_v38  ;;  %vm4931_vm8 = vcmp.eq.s32.totalorder %v4008_v61, %v3910_v51  ;;  %2957 = vmatprep.mubr.f32.mxu0 %v376_v5  ;;  %vm149_vm9 = vcmp.eq.s32.totalorder %v4010_v1, %v3910_v51  ;;  %v378_v57 = vand.u32 4294901760, %v377_v49  ;;  %v396_v14 = vand.u32 4294901760, %v4004_v38 }
  0x93   :  { %3196 = vmatprep.subr.bf16.mxu1 %v3732_v4  ;;  %v2272_v26 = vsel %vm4931_vm8, 1.0, %v4875_v42  ;;  %v2271_v16 = vsel %vm149_vm9, 1.0, %v4875_v42  ;;  %v406_v36 = vand.u32 4294901760, %v4002_v25  ;;  %3294 = vmatpush3.bf16.msra.mxu0 %v3700_v56  ;;  %v388_v49 = vand.u32 4294901760, %v387_v50 }
  0x94   :  { %v4029_v46 = vsub.f32 %v2272_v26, %v2272_v26  ;;  %v4031_v5 = vsub.f32 %v2271_v16, %v2271_v16  ;;  %2715 = vmatmul.mubr.f32.gmra.mrb[2].mxu1 %v368_v11  ;;  %2958 = vmatmul.mubr.f32.gmra.mrb[4].mxu0 %v386_v54  ;;  %v397_v6 = vsub.f32 %v4004_v38, %v396_v14  ;;  %v4942_v11 = vmov 0.0  }
  0x95   :  { %v4034_v30 = vpop.permute.xlu1 %79  ;;  %2717 = vmatprep.mubr.f32.mxu1 %v378_v57  ;;  %2960 = vmatprep.mubr.f32.mxu0 %v396_v14  ;;  %v4036_v24 = vpop.permute.xlu0 %76  ;;  %v407_v42 = vsub.f32 %v4002_v25, %v406_v36 }
  0x96   :  { %4940 = vst [vmem:[#allocation10_spill] sm:$0xff] %v4029_v46  ;;  %4941 = vst [vmem:[#allocation11_spill] sm:$0xff] %v4031_v5  ;;  %vm4929_vm10 = vcmp.eq.s32.totalorder %v4034_v30, %v3910_v51  ;;  %vm4927_vm11 = vcmp.eq.s32.totalorder %v4036_v24, %v3910_v51  ;;  %3198 = vmatpush3.bf16.msra.mxu1 %v3732_v4  ;;  %v398_v56 = vand.u32 4294901760, %v397_v6  ;;  %v416_v54 = vand.u32 4294901760, %v4031_v5 }
  0x97   :  { %3296 = vmatprep.subr.bf16.mxu0 %v3768_v18  ;;  %v2274_v50 = vsel %vm4929_vm10, 1.0, %v4942_v11  ;;  %v2273_v57 = vsel %vm4927_vm11, 1.0, %v4942_v11  ;;  %v426_v14 = vand.u32 4294901760, %v4029_v46  ;;  %3200 = vmatprep.subr.bf16.mxu1 %v3786_v35  ;;  %v408_v38 = vand.u32 4294901760, %v407_v42 }
  0x98   :  { %3298 = vmatpush3.bf16.msra.mxu0 %v3768_v18  ;;  %v4057_v4 = vsub.f32 %v2274_v50, %v2274_v50  ;;  %v4059_v26 = vsub.f32 %v2273_v57, %v2273_v57  ;;  %2718 = vmatmul.mubr.f32.gmra.mrb[4].mxu1 %v388_v49  ;;  %v417_v16 = vsub.f32 %v4031_v5, %v416_v54 }
  0x99   :  { %2961 = vmatmul.mubr.f32.gmra.mrb[6].mxu0 %v406_v36  ;;  %v4062_v6 = vpop.permute.xlu1 %85  ;;  %2720 = vmatprep.mubr.f32.mxu1 %v398_v56  ;;  %v4064_v25 = vpop.permute.xlu0 %82  ;;  %v427_v15 = vsub.f32 %v4029_v46, %v426_v14 }
  0x9a   :  { %4943 = vst [vmem:[#allocation12_spill] sm:$0xff] %v4057_v4  ;;  %4944 = vst [vmem:[#allocation13_spill] sm:$0xff] %v4059_v26  ;;  %2963 = vmatprep.mubr.f32.mxu0 %v416_v54  ;;  %vm4930_vm12 = vcmp.eq.s32.totalorder %v4062_v6, %v3910_v51  ;;  %vm4928_vm13 = vcmp.eq.s32.totalorder %v4064_v25, %v3910_v51  ;;  %v418_v18 = vand.u32 4294901760, %v417_v16  ;;  %v436_v36 = vand.u32 4294901760, %v4059_v26 }
  0x9b   :  { %3202 = vmatpush3.bf16.msra.mxu1 %v3786_v35  ;;  %3300 = vmatprep.subr.bf16.mxu0 %v3816_v58  ;;  %v2276_v42 = vsel %vm4930_vm12, 1.0, %v4942_v11  ;;  %v2275_v49 = vsel %vm4928_vm13, 1.0, %v4942_v11  ;;  %v446_v56 = vand.u32 4294901760, %v4057_v4  ;;  %v428_v46 = vand.u32 4294901760, %v427_v15 }
  0x9c   :  { %3204 = vmatprep.subr.bf16.mxu1 %v3828_v2  ;;  %3302 = vmatpush3.bf16.msra.mxu0 %v3816_v58  ;;  %v4085_v54 = vsub.f32 %v2276_v42, %v2276_v42  ;;  %v4087_v35 = vsub.f32 %v2275_v49, %v2275_v49  ;;  %v437_v50 = vsub.f32 %v4059_v26, %v436_v36 }
  0x9d   :  { %2721 = vmatmul.mubr.f32.gmra.mrb[6].mxu1 %v408_v38  ;;  %2964 = vmatmul.mubr.f32.gmra.mrb[8].mxu0 %v426_v14  ;;  %v4090_v57 = vpop.permute.xlu1 %91  ;;  %v4092_v16 = vpop.permute.xlu0 %88  ;;  %v447_v5 = vsub.f32 %v4057_v4, %v446_v56 }
  0x9e   :  { %4945 = vst [vmem:[#allocation14_spill] sm:$0xff] %v4085_v54  ;;  %4946 = vst [vmem:[#allocation15_spill] sm:$0xff] %v4087_v35  ;;  %2723 = vmatprep.mubr.f32.mxu1 %v418_v18  ;;  %2966 = vmatprep.mubr.f32.mxu0 %v436_v36  ;;  %vm4884_vm14 = vcmp.eq.s32.totalorder %v4090_v57, %v3910_v51  ;;  %vm4885_vm15 = vcmp.eq.s32.totalorder %v4092_v16, %v3910_v51  ;;  %v438_v58 = vand.u32 4294901760, %v437_v50 }
  0x9f   :  { %v456_v38 = vand.u32 4294901760, %v4087_v35  ;;  %3206 = vmatpush3.bf16.msra.mxu1 %v3828_v2  ;;  %3304 = vmatprep.subr.bf16.mxu0 %v3842_v19  ;;  %v2278_v15 = vsel %vm4884_vm14, 1.0, %v4942_v11  ;;  %v2277_v14 = vsel %vm4885_vm15, 1.0, %v4942_v11  ;;  %v466_v18 = vand.u32 4294901760, %v4085_v54 }
  0xa0   :  { %3208 = vmatprep.subr.bf16.mxu1 %v3850_v20  ;;  %3306 = vmatpush3.bf16.msra.mxu0 %v3842_v19  ;;  %v4113_v36 = vsub.f32 %v2278_v15, %v2278_v15  ;;  %v4115_v2 = vsub.f32 %v2277_v14, %v2277_v14  ;;  %v448_v4 = vand.u32 4294901760, %v447_v5 }
  0xa1   :  { %2724 = vmatmul.mubr.f32.gmra.mrb[8].mxu1 %v428_v46  ;;  %2967 = vmatmul.mubr.f32.gmra.mrb[10].mxu0 %v446_v56  ;;  %v457_v42 = vsub.f32 %v4087_v35, %v456_v38  ;;  %v4118_v49 = vpop.permute.xlu1 %97  ;;  %v4120_v50 = vpop.permute.xlu0 %94  ;;  %v467_v26 = vsub.f32 %v4085_v54, %v466_v18 }
  0xa2   :  { %4947 = vst [vmem:[#allocation16_spill] sm:$0xff] %v4113_v36  ;;  %4948 = vst [vmem:[#allocation17_spill] sm:$0xff] %v4115_v2  ;;  %2726 = vmatprep.mubr.f32.mxu1 %v438_v58  ;;  %2969 = vmatprep.mubr.f32.mxu0 %v456_v38  ;;  %vm4888_vm14 = vcmp.eq.s32.totalorder %v4118_v49, %v3910_v51  ;;  %vm4889_vm15 = vcmp.eq.s32.totalorder %v4120_v50, %v3910_v51  ;;  %v476_v46 = vand.u32 4294901760, %v4115_v2 }
  0xa3   :  { %v458_v19 = vand.u32 4294901760, %v457_v42  ;;  %3210 = vmatpush3.bf16.msra.mxu1 %v3850_v20  ;;  %3308 = vmatprep.subr.bf16.mxu0 %v3864_v31  ;;  %v2280_v5 = vsel %vm4888_vm14, 1.0, %v4942_v11  ;;  %v2279_v56 = vsel %vm4889_vm15, 1.0, %v4942_v11  ;;  %v486_v58 = vand.u32 4294901760, %v4113_v36 }
  0xa4   :  { %3212 = vmatprep.subr.bf16.mxu1 %v3872_v55  ;;  %3310 = vmatpush3.bf16.msra.mxu0 %v3864_v31  ;;  %v4141_v38 = vsub.f32 %v2280_v5, %v2280_v5  ;;  %v4143_v20 = vsub.f32 %v2279_v56, %v2279_v56  ;;  %v477_v15 = vsub.f32 %v4115_v2, %v476_v46  ;;  %v468_v54 = vand.u32 4294901760, %v467_v26 }
  0xa5   :  { %2727 = vmatmul.mubr.f32.gmra.mrb[10].mxu1 %v448_v4  ;;  %2970 = vmatmul.mubr.f32.gmra.mrb[12].mxu0 %v466_v18  ;;  %v4146_v14 = vpop.permute.xlu1 %103  ;;  %v4148_v42 = vpop.permute.xlu0 %100  ;;  %v487_v35 = vsub.f32 %v4113_v36, %v486_v58  ;;  %v5013_v52 = vld [vmem:[#allocation15_spill] sm:$0xff]  ;;  %v5015_v41 = vld [vmem:[#allocation14_spill] sm:$0xff] }
  0xa6   :  { %4949 = vst [vmem:[#allocation18_spill] sm:$0xff] %v4141_v38  ;;  %4950 = vst [vmem:[#allocation19_spill] sm:$0xff] %v4143_v20  ;;  %2729 = vmatprep.mubr.f32.mxu1 %v458_v19  ;;  %2972 = vmatprep.mubr.f32.mxu0 %v476_v46  ;;  %vm4892_vm14 = vcmp.eq.s32.totalorder %v4146_v14, %v3910_v51  ;;  %vm4893_vm15 = vcmp.eq.s32.totalorder %v4148_v42, %v3910_v51  ;;  %v478_v31 = vand.u32 4294901760, %v477_v15 }
  0xa7   :  { %v496_v4 = vand.u32 4294901760, %v4143_v20  ;;  %3214 = vmatpush3.bf16.msra.mxu1 %v3872_v55  ;;  %3312 = vmatprep.subr.bf16.mxu0 %v3874_v10  ;;  %v2282_v26 = vsel %vm4892_vm14, 1.0, %v4942_v11  ;;  %v2281_v18 = vsel %vm4893_vm15, 1.0, %v4942_v11  ;;  %v506_v19 = vand.u32 4294901760, %v4141_v38 }
  0xa8   :  { %3216 = vmatprep.subr.bf16.mxu1 %v3882_v63  ;;  %3314 = vmatpush3.bf16.msra.mxu0 %v3874_v10  ;;  %v4169_v46 = vsub.f32 %v2282_v26, %v2282_v26  ;;  %v4171_v55 = vsub.f32 %v2281_v18, %v2281_v18  ;;  %v488_v36 = vand.u32 4294901760, %v487_v35 }
  0xa9   :  { %2730 = vmatmul.mubr.f32.gmra.mrb[12].mxu1 %v468_v54  ;;  %2973 = vmatmul.mubr.f32.gmra.mrb[14].mxu0 %v486_v58  ;;  %v497_v5 = vsub.f32 %v4143_v20, %v496_v4  ;;  %v4174_v56 = vpop.permute.xlu1 %109  ;;  %v4176_v15 = vpop.permute.xlu0 %106  ;;  %v507_v2 = vsub.f32 %v4141_v38, %v506_v19  ;;  %v5017_v8 = vld [vmem:[#allocation17_spill] sm:$0xff]  ;;  %v5019_v9 = vld [vmem:[#allocation16_spill] sm:$0xff] }
  0xaa   :  { %4951 = vst [vmem:[#allocation20_spill] sm:$0xff] %v4169_v46  ;;  %4952 = vst [vmem:[#allocation21_spill] sm:$0xff] %v4171_v55  ;;  %2732 = vmatprep.mubr.f32.mxu1 %v478_v31  ;;  %2975 = vmatprep.mubr.f32.mxu0 %v496_v4  ;;  %vm4896_vm14 = vcmp.eq.s32.totalorder %v4174_v56, %v3910_v51  ;;  %vm4897_vm15 = vcmp.eq.s32.totalorder %v4176_v15, %v3910_v51  ;;  %v516_v54 = vand.u32 4294901760, %v4171_v55 }
  0xab   :  { %v498_v10 = vand.u32 4294901760, %v497_v5  ;;  %3218 = vmatpush3.bf16.msra.mxu1 %v3882_v63  ;;  %3316 = vmatprep.subr.bf16.mxu0 %v3884_v32  ;;  %v2284_v35 = vsel %vm4896_vm14, 1.0, %v4942_v11  ;;  %v2283_v58 = vsel %vm4897_vm15, 1.0, %v4942_v11  ;;  %v526_v31 = vand.u32 4294901760, %v4169_v46 }
  0xac   :  { %3220 = vmatprep.subr.bf16.mxu1 %v3886_v37  ;;  %3318 = vmatpush3.bf16.msra.mxu0 %v3884_v32  ;;  %v4197_v4 = vsub.f32 %v2284_v35, %v2284_v35  ;;  %v4199_v63 = vsub.f32 %v2283_v58, %v2283_v58  ;;  %v517_v26 = vsub.f32 %v4171_v55, %v516_v54  ;;  %v508_v38 = vand.u32 4294901760, %v507_v2 }
  0xad   :  { %2733 = vmatmul.mubr.f32.gmra.mrb[14].mxu1 %v488_v36  ;;  %2976 = vmatmul.mubr.f32.gmra.mrb[16].mxu0 %v506_v19  ;;  %v4202_v18 = vpop.permute.xlu1 %115  ;;  %v4204_v5 = vpop.permute.xlu0 %112  ;;  %v527_v20 = vsub.f32 %v4169_v46, %v526_v31  ;;  %v5023_v59 = vld [vmem:[#allocation18_spill] sm:$0xff] }
  0xae   :  { %4953 = vst [vmem:[#allocation22_spill] sm:$0xff] %v4197_v4  ;;  %4954 = vst [vmem:[#allocation23_spill] sm:$0xff] %v4199_v63  ;;  %2735 = vmatprep.mubr.f32.mxu1 %v498_v10  ;;  %2978 = vmatprep.mubr.f32.mxu0 %v516_v54  ;;  %vm4900_vm14 = vcmp.eq.s32.totalorder %v4202_v18, %v3910_v51  ;;  %vm4901_vm15 = vcmp.eq.s32.totalorder %v4204_v5, %v3910_v51  ;;  %v518_v32 = vand.u32 4294901760, %v517_v26 }
  0xaf   :  { %v536_v36 = vand.u32 4294901760, %v4199_v63  ;;  %3222 = vmatpush3.bf16.msra.mxu1 %v3886_v37  ;;  %3320 = vmatprep.subr.bf16.mxu0 %v3586_v21  ;;  %v2286_v2 = vsel %vm4900_vm14, 1.0, %v4942_v11  ;;  %v2285_v19 = vsel %vm4901_vm15, 1.0, %v4942_v11  ;;  %v546_v10 = vand.u32 4294901760, %v4197_v4 }
  0xb0   :  { %3224 = vmatprep.subr.bf16.mxu1 %v3890_v0  ;;  %v4224_v54 = vsub.f32 %v2286_v2, %v2286_v2  ;;  %v4226_v35 = vsub.f32 %v2285_v19, %v2285_v19  ;;  %v528_v46 = vand.u32 4294901760, %v527_v20 }
  0xb1   :  { %2736 = vmatmul.mubr.f32.gmra.mrb[16].mxu1 %v508_v38  ;;  %2979 = vmatmul.mubr.f32.gmra.mrb[18].mxu0 %v526_v31  ;;  %v537_v37 = vsub.f32 %v4199_v63, %v536_v36  ;;  %v4229_v58 = vpop.permute.xlu1 %121  ;;  %v4231_v26 = vpop.permute.xlu0 %118  ;;  %v547_v55 = vsub.f32 %v4197_v4, %v546_v10  ;;  %v5025_v60 = vld [vmem:[#allocation21_spill] sm:$0xff]  ;;  %v5027_v17 = vld [vmem:[#allocation20_spill] sm:$0xff] }
  0xb2   :  { %4955 = vst [vmem:[#allocation24_spill] sm:$0xff] %v4224_v54  ;;  %4956 = vst [vmem:[#allocation25_spill] sm:$0xff] %v4226_v35  ;;  %2738 = vmatprep.mubr.f32.mxu1 %v518_v32  ;;  %2981 = vmatprep.mubr.f32.mxu0 %v536_v36  ;;  %vm4906_vm14 = vcmp.eq.s32.totalorder %v4229_v58, %v3910_v51  ;;  %vm4907_vm15 = vcmp.eq.s32.totalorder %v4231_v26, %v3910_v51  ;;  %v556_v38 = vand.u32 4294901760, %v4226_v35 }
  0xb3   :  { %v538_v2 = vand.u32 4294901760, %v537_v37  ;;  %v2288_v31 = vsel %vm4906_vm14, 1.0, %v4942_v11  ;;  %v2287_v20 = vsel %vm4907_vm15, 1.0, %v4942_v11  ;;  %v566_v32 = vand.u32 4294901760, %v4224_v54 }
  0xb4   :  { %v4248_v36 = vsub.f32 %v2288_v31, %v2288_v31  ;;  %v4250_v19 = vsub.f32 %v2287_v20, %v2287_v20  ;;  %v557_v37 = vsub.f32 %v4226_v35, %v556_v38  ;;  %v548_v53 = vand.u32 4294901760, %v547_v55 }
  0xb5   :  { %2739 = vmatmul.mubr.f32.gmra.mrb[18].mxu1 %v528_v46  ;;  %2982 = vmatmul.mubr.f32.gmra.mrb[20].mxu0 %v546_v10  ;;  %v4253_v4 = vpop.permute.xlu1 %127  ;;  %v4255_v63 = vpop.permute.xlu0 %124  ;;  %v567_v40 = vsub.f32 %v4224_v54, %v566_v32  ;;  %v5029_v33 = vld [vmem:[#allocation23_spill] sm:$0xff] }
  0xb6   :  { %4957 = vst [vmem:[#allocation26_spill] sm:$0xff] %v4248_v36  ;;  %4958 = vst [vmem:[#allocation27_spill] sm:$0xff] %v4250_v19  ;;  %2741 = vmatprep.mubr.f32.mxu1 %v538_v2  ;;  %2984 = vmatprep.mubr.f32.mxu0 %v556_v38  ;;  %vm4912_vm14 = vcmp.eq.s32.totalorder %v4253_v4, %v3910_v51  ;;  %vm4913_vm15 = vcmp.eq.s32.totalorder %v4255_v63, %v3910_v51  ;;  %v558_v31 = vand.u32 4294901760, %v557_v37 }
  0xb7   :  { %v576_v46 = vand.u32 4294901760, %v4250_v19  ;;  %v2290_v10 = vsel %vm4912_vm14, 1.0, %v4942_v11  ;;  %v2289_v55 = vsel %vm4913_vm15, 1.0, %v4942_v11  ;;  %v586_v2 = vand.u32 4294901760, %v4248_v36 }
  0xb8   :  { %v4272_v38 = vsub.f32 %v2290_v10, %v2290_v10  ;;  %v4274_v20 = vsub.f32 %v2289_v55, %v2289_v55  ;;  %v568_v44 = vand.u32 4294901760, %v567_v40 }
  0xb9   :  { %2742 = vmatmul.mubr.f32.gmra.mrb[20].mxu1 %v548_v53  ;;  %2985 = vmatmul.mubr.f32.gmra.mrb[22].mxu0 %v566_v32  ;;  %v577_v37 = vsub.f32 %v4250_v19, %v576_v46  ;;  %v4277_v54 = vpop.permute.xlu1 %133  ;;  %v4279_v35 = vpop.permute.xlu0 %130  ;;  %v587_v43 = vsub.f32 %v4248_v36, %v586_v2  ;;  %v5035_v1 = vld [vmem:[#allocation24_spill] sm:$0xff] }
  0xba   :  { %4959 = vst [vmem:[#allocation28_spill] sm:$0xff] %v4272_v38  ;;  %4960 = vst [vmem:[#allocation29_spill] sm:$0xff] %v4274_v20  ;;  %2744 = vmatprep.mubr.f32.mxu1 %v558_v31  ;;  %2987 = vmatprep.mubr.f32.mxu0 %v576_v46  ;;  %vm4919_vm14 = vcmp.eq.s32.totalorder %v4277_v54, %v3910_v51  ;;  %vm4920_vm15 = vcmp.eq.s32.totalorder %v4279_v35, %v3910_v51  ;;  %v596_v53 = vand.u32 4294901760, %v4274_v20 }
  0xbb   :  { %4961 = vst [vmem:[#allocation30_spill] sm:$0xff] %v4277_v54  ;;  %4962 = vst [vmem:[#allocation31_spill] sm:$0xff] %v4279_v35  ;;  %v578_v10 = vand.u32 4294901760, %v577_v37  ;;  %v2292_v32 = vsel %vm4919_vm14, 1.0, %v4942_v11  ;;  %v2291_v40 = vsel %vm4920_vm15, 1.0, %v4942_v11  ;;  %v606_v31 = vand.u32 4294901760, %v4272_v38 }
  0xbc   :  { %v4296_v46 = vsub.f32 %v2292_v32, %v2292_v32  ;;  %v4298_v55 = vsub.f32 %v2291_v40, %v2291_v40  ;;  %v597_v37 = vsub.f32 %v4274_v20, %v596_v53  ;;  %v588_v45 = vand.u32 4294901760, %v587_v43 }
  0xbd   :  { %2745 = vmatmul.mubr.f32.gmra.mrb[22].mxu1 %v568_v44  ;;  %2988 = vmatmul.mubr.f32.gmra.mrb[24].mxu0 %v586_v2  ;;  %v4301_v36 = vpop.permute.xlu1 %139  ;;  %v4303_v19 = vpop.permute.xlu0 %136  ;;  %v607_v54 = vsub.f32 %v4272_v38, %v606_v31 }
  0xbe   :  { %4963 = vst [vmem:[#allocation32_spill] sm:$0xff] %v4301_v36  ;;  %2747 = vmatprep.mubr.f32.mxu1 %v578_v10  ;;  %2990 = vmatprep.mubr.f32.mxu0 %v596_v53  ;;  %vm172_vm14 = vcmp.eq.s32.totalorder %v4301_v36, %v3910_v51  ;;  %vm171_vm15 = vcmp.eq.s32.totalorder %v4303_v19, %v3910_v51  ;;  %v598_v32 = vand.u32 4294901760, %v597_v37  ;;  %v616_v44 = vand.u32 4294901760, %v4298_v55 }
  0xbf   :  { %v2294_v2 = vsel %vm172_vm14, 1.0, %v4942_v11  ;;  %v2293_v43 = vsel %vm171_vm15, 1.0, %v4942_v11  ;;  %v626_v10 = vand.u32 4294901760, %v4296_v46  ;;  %v608_v38 = vand.u32 4294901760, %v607_v54 }
  0xc0   :  { %v4320_v53 = vsub.f32 %v2294_v2, %v2294_v2  ;;  %v4322_v40 = vsub.f32 %v2293_v43, %v2293_v43  ;;  %v617_v37 = vsub.f32 %v4298_v55, %v616_v44  ;;  %v3518_v54 = vmov 1.0  }
  0xc1   :  { %2748 = vmatmul.mubr.f32.gmra.mrb[24].mxu1 %v588_v45  ;;  %2991 = vmatmul.mubr.f32.gmra.mrb[26].mxu0 %v606_v31  ;;  %v627_v35 = vsub.f32 %v4296_v46, %v626_v10 }
  0xc2   :  { %2750 = vmatprep.mubr.f32.mxu1 %v598_v32  ;;  %2993 = vmatprep.mubr.f32.mxu0 %v616_v44  ;;  %v618_v20 = vand.u32 4294901760, %v617_v37  ;;  %v636_v36 = vand.u32 4294901760, %v4322_v40  ;;  %v646_v11 = vand.u32 4294901760, %v4320_v53 }
  0xc3   :  { %v628_v45 = vand.u32 4294901760, %v627_v35 }
  0xc4   :  { %v637_v2 = vsub.f32 %v4322_v40, %v636_v36  ;;  %v647_v43 = vsub.f32 %v4320_v53, %v646_v11 }
  0xc5   :  { %2751 = vmatmul.mubr.f32.gmra.mrb[26].mxu1 %v608_v38  ;;  %2994 = vmatmul.mubr.f32.gmra.mrb[28].mxu0 %v626_v10 }
  0xc6   :  { %2753 = vmatprep.mubr.f32.mxu1 %v618_v20  ;;  %2996 = vmatprep.mubr.f32.mxu0 %v636_v36  ;;  %v638_v31 = vand.u32 4294901760, %v637_v2  ;;  %v648_v32 = vand.u32 4294901760, %v647_v43 }
  0xc9   :  { %2754 = vmatmul.mubr.f32.gmra.mrb[28].mxu1 %v628_v45  ;;  %2997 = vmatmul.mubr.f32.gmra.mrb[30].mxu0 %v646_v11 }
  0xca   :  { %2756 = vmatprep.mubr.f32.mxu1 %v638_v31  ;;  %3031 = vmatprep.mubr.msk.f32.mxu0 %vm141_vm1, %v3518_v54 }
  0xcd   :  { %2757 = vmatmul.mubr.f32.gmra.mrb[30].mxu1 %v648_v32  ;;  %3032 = vmatmul.mubr.msk.f32.vlgmr.msra.gmra.mrb[0].mxu0 %vm142_vm3, %v3518_v54 }
  0xce   :  { %2791 = vmatprep.mubr.msk.f32.mxu1 %vm141_vm1, %v3518_v54  ;;  %3034 = vmatprep.mubr.msk.f32.mxu0 %vm143_vm0, %v3518_v54 }
  0xcf   :  { %3322 = vmatpush3.bf16.msra.mxu0 %v3586_v21  ;;  %v4988_v21 = vld [vmem:[#allocation31_spill] sm:$0xff] }
  0xd0   :  { %3324 = vmatprep.subr.bf16.mxu0 %v3588_v22 }
  0xd1   :  { %2792 = vmatmul.mubr.msk.f32.vlgmr.msra.gmra.mrb[0].mxu1 %vm142_vm3, %v3518_v54  ;;  %3035 = vmatmul.mubr.msk.f32.gmra.mrb[2].mxu0 %vm144_vm2, %v3518_v54 }
  0xd2   :  { %3226 = vmatpush3.bf16.msra.mxu1 %v3890_v0  ;;  %2794 = vmatprep.mubr.msk.f32.mxu1 %vm143_vm0, %v3518_v54  ;;  %v5001_v0 = vld [vmem:[#allocation6_spill] sm:$0xff] }
  0xd3   :  { %3037 = vmatprep.mubr.msk.f32.mxu0 %vm145_vm5, %v3518_v54  ;;  %3228 = vmatprep.subr.bf16.mxu1 %v3894_v3 }
  0xd4   :  { %3326 = vmatpush3.bf16.msra.mxu0 %v3588_v22  ;;  %v4991_v22 = vld [vmem:[#allocation30_spill] sm:$0xff] }
  0xd5   :  { %2795 = vmatmul.mubr.msk.f32.gmra.mrb[2].mxu1 %vm144_vm2, %v3518_v54  ;;  %3038 = vmatmul.mubr.msk.f32.gmra.mrb[4].mxu0 %vm146_vm4, %v3518_v54 }
  0xd6   :  { %2797 = vmatprep.mubr.msk.f32.mxu1 %vm145_vm5, %v3518_v54  ;;  %3040 = vmatprep.mubr.msk.f32.mxu0 %vm147_vm7, %v3518_v54 }
  0xd7   :  { %3230 = vmatpush3.bf16.msra.mxu1 %v3894_v3  ;;  %3328 = vmatprep.subr.bf16.mxu0 %v3618_v29  ;;  %v5002_v3 = vld [vmem:[#allocation9_spill] sm:$0xff] }
  0xd8   :  { %3232 = vmatprep.subr.bf16.mxu1 %v3898_v7  ;;  %3330 = vmatpush3.bf16.msra.mxu0 %v3618_v29 }
  0xd9   :  { %2798 = vmatmul.mubr.msk.f32.gmra.mrb[4].mxu1 %vm146_vm4, %v3518_v54  ;;  %3041 = vmatmul.mubr.msk.f32.gmra.mrb[6].mxu0 %vm148_vm6, %v3518_v54 }
  0xda   :  { %2800 = vmatprep.mubr.msk.f32.mxu1 %vm147_vm7, %v3518_v54  ;;  %3043 = vmatprep.mubr.msk.f32.mxu0 %vm149_vm9, %v3518_v54 }
  0xdb   :  { %3234 = vmatpush3.bf16.msra.mxu1 %v3898_v7  ;;  %3332 = vmatprep.subr.bf16.mxu0 %v3653_v39  ;;  %v5003_v7 = vld [vmem:[#allocation8_spill] sm:$0xff] }
  0xdc   :  { %3236 = vmatprep.subr.bf16.mxu1 %v3902_v13  ;;  %3334 = vmatpush3.bf16.msra.mxu0 %v3653_v39  ;;  %v4996_v39 = vld [vmem:[#allocation3_spill] sm:$0xff] }
  0xdd   :  { %2801 = vmatmul.mubr.msk.f32.gmra.mrb[6].mxu1 %vm148_vm6, %v3518_v54  ;;  %3044 = vmatmul.mubr.msk.f32.gmra.mrb[8].mxu0 %vm4931_vm8, %v3518_v54 }
  0xde   :  { %2803 = vmatprep.mubr.msk.f32.mxu1 %vm149_vm9, %v3518_v54  ;;  %3046 = vmatprep.mubr.msk.f32.mxu0 %vm4927_vm11, %v3518_v54 }
  0xdf   :  { %3238 = vmatpush3.bf16.msra.mxu1 %v3902_v13  ;;  %3336 = vmatprep.subr.bf16.mxu0 %v3679_v48  ;;  %v5005_v13 = vld [vmem:[#allocation11_spill] sm:$0xff] }
  0xe0   :  { %3240 = vmatprep.subr.bf16.mxu1 %v3904_v28  ;;  %3338 = vmatpush3.bf16.msra.mxu0 %v3679_v48  ;;  %v4997_v48 = vld [vmem:[#allocation5_spill] sm:$0xff] }
  0xe1   :  { %2804 = vmatmul.mubr.msk.f32.gmra.mrb[8].mxu1 %vm4931_vm8, %v3518_v54  ;;  %3047 = vmatmul.mubr.msk.f32.gmra.mrb[10].mxu0 %vm4929_vm10, %v3518_v54 }
  0xe2   :  { %2806 = vmatprep.mubr.msk.f32.mxu1 %vm4927_vm11, %v3518_v54  ;;  %3049 = vmatprep.mubr.msk.f32.mxu0 %vm4928_vm13, %v3518_v54  ;;  %vm4964_vm11 = vcmp.eq.s32.totalorder %v4092_v16, %v3910_v51 }
  0xe3   :  { %3242 = vmatpush3.bf16.msra.mxu1 %v3904_v28  ;;  %3340 = vmatprep.subr.bf16.mxu0 %v3715_v62  ;;  %v5007_v28 = vld [vmem:[#allocation10_spill] sm:$0xff] }
  0xe4   :  { %3244 = vmatprep.subr.bf16.mxu1 %v3906_v34  ;;  %3342 = vmatpush3.bf16.msra.mxu0 %v3715_v62  ;;  %v4998_v62 = vld [vmem:[#allocation2_spill] sm:$0xff] }
  0xe5   :  { %2807 = vmatmul.mubr.msk.f32.gmra.mrb[10].mxu1 %vm4929_vm10, %v3518_v54  ;;  %3050 = vmatmul.mubr.msk.f32.gmra.mrb[12].mxu0 %vm4930_vm12, %v3518_v54  ;;  %vm4966_vm10 = vcmp.eq.s32.totalorder %v4120_v50, %v3910_v51 }
  0xe6   :  { %2809 = vmatprep.mubr.msk.f32.mxu1 %vm4928_vm13, %v3518_v54  ;;  %3052 = vmatprep.mubr.msk.f32.mxu0 %vm4964_vm11, %v3518_v54  ;;  %vm4965_vm13 = vcmp.eq.s32.totalorder %v4090_v57, %v3910_v51 }
  0xe7   :  { %3246 = vmatpush3.bf16.msra.mxu1 %v3906_v34  ;;  %3344 = vmatprep.subr.bf16.mxu0 %v3759_v12  ;;  %v5009_v34 = vld [vmem:[#allocation13_spill] sm:$0xff] }
  0xe8   :  { %3248 = vmatprep.subr.bf16.mxu1 %v3908_v47  ;;  %3346 = vmatpush3.bf16.msra.mxu0 %v3759_v12  ;;  %v4999_v12 = vld [vmem:[#allocation4_spill] sm:$0xff] }
  0xe9   :  { %2810 = vmatmul.mubr.msk.f32.gmra.mrb[12].mxu1 %vm4930_vm12, %v3518_v54  ;;  %3053 = vmatmul.mubr.msk.f32.gmra.mrb[14].mxu0 %vm4965_vm13, %v3518_v54  ;;  %vm4968_vm12 = vcmp.eq.s32.totalorder %v4148_v42, %v3910_v51 }
  0xea   :  { %2812 = vmatprep.mubr.msk.f32.mxu1 %vm4964_vm11, %v3518_v54  ;;  %3055 = vmatprep.mubr.msk.f32.mxu0 %vm4966_vm10, %v3518_v54  ;;  %vm4967_vm11 = vcmp.eq.s32.totalorder %v4118_v49, %v3910_v51 }
  0xeb   :  { %3250 = vmatpush3.bf16.msra.mxu1 %v3908_v47  ;;  %3348 = vmatprep.subr.bf16.mxu0 %v3782_v27  ;;  %v5011_v47 = vld [vmem:[#allocation12_spill] sm:$0xff] }
  0xec   :  { %3252 = vmatprep.subr.bf16.mxu1 %v3936_v23  ;;  %3350 = vmatpush3.bf16.msra.mxu0 %v3782_v27  ;;  %v5000_v27 = vld [vmem:[#allocation7_spill] sm:$0xff] }
  0xed   :  { %2813 = vmatmul.mubr.msk.f32.gmra.mrb[14].mxu1 %vm4965_vm13, %v3518_v54  ;;  %3056 = vmatmul.mubr.msk.f32.gmra.mrb[16].mxu0 %vm4967_vm11, %v3518_v54  ;;  %vm4969_vm13 = vmmov %vm4967_vm11  ;;  %vm4970_vm11 = vcmp.eq.s32.totalorder %v4146_v14, %v3910_v51 }
  0xee   :  { %2815 = vmatprep.mubr.msk.f32.mxu1 %vm4966_vm10, %v3518_v54  ;;  %3058 = vmatprep.mubr.msk.f32.mxu0 %vm4968_vm12, %v3518_v54  ;;  %vm4971_vm10 = vmmov %vm4968_vm12  ;;  %vm4972_vm12 = vcmp.eq.s32.totalorder %v4176_v15, %v3910_v51 }
  0xef   :  { %3254 = vmatpush3.bf16.msra.mxu1 %v3936_v23  ;;  %vm4973_vm8 = vmmov %vm4970_vm11  ;;  %v5021_v23 = vld [vmem:[#allocation19_spill] sm:$0xff] }
  0xf1   :  { %2816 = vmatmul.mubr.msk.f32.gmra.mrb[16].mxu1 %vm4969_vm13, %v3518_v54  ;;  %3059 = vmatmul.mubr.msk.f32.gmra.mrb[18].mxu0 %vm4970_vm11, %v3518_v54  ;;  %vm4974_vm13 = vcmp.eq.s32.totalorder %v4174_v56, %v3910_v51  ;;  %vm4975_vm11 = vmmov %vm4972_vm12 }
  0xf2   :  { %2818 = vmatprep.mubr.msk.f32.mxu1 %vm4971_vm10, %v3518_v54  ;;  %3061 = vmatprep.mubr.msk.f32.mxu0 %vm4972_vm12, %v3518_v54  ;;  %vm4976_vm10 = vcmp.eq.s32.totalorder %v4204_v5, %v3910_v51  ;;  %vm4977_vm12 = vmmov %vm4974_vm13 }
  0xf5   :  { %2819 = vmatmul.mubr.msk.f32.gmra.mrb[18].mxu1 %vm4973_vm8, %v3518_v54  ;;  %3062 = vmatmul.mubr.msk.f32.gmra.mrb[20].mxu0 %vm4974_vm13, %v3518_v54  ;;  %vm4978_vm8 = vcmp.eq.s32.totalorder %v4202_v18, %v3910_v51  ;;  %vm4979_vm13 = vmmov %vm4976_vm10 }
  0xf6   :  { %2821 = vmatprep.mubr.msk.f32.mxu1 %vm4975_vm11, %v3518_v54  ;;  %3064 = vmatprep.mubr.msk.f32.mxu0 %vm4976_vm10, %v3518_v54  ;;  %vm4980_vm11 = vcmp.eq.s32.totalorder %v4231_v26, %v3910_v51  ;;  %vm4981_vm10 = vmmov %vm4978_vm8 }
  0xf9   :  { %2822 = vmatmul.mubr.msk.f32.gmra.mrb[20].mxu1 %vm4977_vm12, %v3518_v54  ;;  %3065 = vmatmul.mubr.msk.f32.gmra.mrb[22].mxu0 %vm4978_vm8, %v3518_v54  ;;  %vm4982_vm12 = vcmp.eq.s32.totalorder %v4229_v58, %v3910_v51  ;;  %vm4983_vm8 = vmmov %vm4980_vm11 }
  0xfa   :  { %2824 = vmatprep.mubr.msk.f32.mxu1 %vm4979_vm13, %v3518_v54  ;;  %3067 = vmatprep.mubr.msk.f32.mxu0 %vm4980_vm11, %v3518_v54  ;;  %vm4984_vm13 = vcmp.eq.s32.totalorder %v4255_v63, %v3910_v51  ;;  %vm4985_vm11 = vmmov %vm4982_vm12 }
  0xfd   :  { %2825 = vmatmul.mubr.msk.f32.gmra.mrb[22].mxu1 %vm4981_vm10, %v3518_v54  ;;  %3068 = vmatmul.mubr.msk.f32.gmra.mrb[24].mxu0 %vm4982_vm12, %v3518_v54  ;;  %vm4986_vm10 = vcmp.eq.s32.totalorder %v4253_v4, %v3910_v51  ;;  %vm4987_vm12 = vmmov %vm4984_vm13 }
  0xfe   :  { %2827 = vmatprep.mubr.msk.f32.mxu1 %vm4983_vm8, %v3518_v54  ;;  %3070 = vmatprep.mubr.msk.f32.mxu0 %vm4984_vm13, %v3518_v54  ;;  %vm4989_vm8 = vcmp.eq.s32.totalorder %v4988_v21, %v3910_v51  ;;  %vm4990_vm13 = vmmov %vm4986_vm10 }
 0x101   :  { %2828 = vmatmul.mubr.msk.f32.gmra.mrb[24].mxu1 %vm4985_vm11, %v3518_v54  ;;  %3071 = vmatmul.mubr.msk.f32.gmra.mrb[26].mxu0 %vm4986_vm10, %v3518_v54  ;;  %vm4992_vm11 = vcmp.eq.s32.totalorder %v4991_v22, %v3910_v51  ;;  %vm4993_vm10 = vmmov %vm4989_vm8 }
 0x102   :  { %2830 = vmatprep.mubr.msk.f32.mxu1 %vm4987_vm12, %v3518_v54  ;;  %3073 = vmatprep.mubr.msk.f32.mxu0 %vm4989_vm8, %v3518_v54  ;;  %vm4994_vm12 = vmmov %vm4992_vm11  ;;  %vm5022_vm8 = vcmp.eq.s32.totalorder %v4148_v42, %v3910_v51 }
 0x105   :  { %2831 = vmatmul.mubr.msk.f32.gmra.mrb[26].mxu1 %vm4990_vm13, %v3518_v54  ;;  %3074 = vmatmul.mubr.msk.f32.gmra.mrb[28].mxu0 %vm4992_vm11, %v3518_v54  ;;  %vm5024_vm13 = vcmp.eq.s32.totalorder %v4146_v14, %v3910_v51  ;;  %vm5026_vm11 = vcmp.eq.s32.totalorder %v4176_v15, %v3910_v51 }
 0x106   :  { %2833 = vmatprep.mubr.msk.f32.mxu1 %vm4993_vm10, %v3518_v54  ;;  %3076 = vmatprep.mubr.msk.f32.mxu0 %vm171_vm15, %v3518_v54  ;;  %vm5028_vm10 = vcmp.eq.s32.totalorder %v4174_v56, %v3910_v51 }
 0x109   :  { %2834 = vmatmul.mubr.msk.f32.gmra.mrb[28].mxu1 %vm4994_vm12, %v3518_v54  ;;  %3077 = vmatmul.mubr.msk.f32.gmra.mrb[30].mxu0 %vm172_vm14, %v3518_v54  ;;  %vm5030_vm12 = vcmp.eq.s32.totalorder %v4204_v5, %v3910_v51 }
 0x10a   :  { %2836 = vmatprep.mubr.msk.f32.mxu1 %vm171_vm15, %v3518_v54  ;;  %3111 = vmatprep.mubr.msk.f32.mxu0 %vm141_vm1, %v3518_v54  ;;  %vm5006_vm1 = vcmp.eq.s32.totalorder %v4036_v24, %v3910_v51  ;;  %v5039_v24 = vld [vmem:[#allocation26_spill] sm:$0xff] }
 0x10d   :  { %2837 = vmatmul.mubr.msk.f32.gmra.mrb[30].mxu1 %vm172_vm14, %v3518_v54  ;;  %3112 = vmatmul.mubr.msk.f32.vlgmr.msra.gmra.mrb[0].mxu0 %vm142_vm3, %v3518_v54  ;;  %vm5010_vm3 = vcmp.eq.s32.totalorder %v4064_v25, %v3910_v51  ;;  %v5031_v25 = vld [vmem:[#allocation22_spill] sm:$0xff] }
 0x10e   :  { %2871 = vmatprep.mubr.f32.mxu1 %v4996_v39  ;;  %3114 = vmatprep.mubr.msk.f32.mxu0 %vm143_vm0, %v3518_v54  ;;  %vm5004_vm0 = vcmp.eq.s32.totalorder %v4008_v61, %v3910_v51  ;;  %v5033_v61 = vld [vmem:[#allocation25_spill] sm:$0xff] }
 0x111   :  { %2872 = vmatmul.mubr.f32.vlgmr.msra.gmra.mrb[0].mxu1 %v4997_v48  ;;  %3115 = vmatmul.mubr.msk.f32.gmra.mrb[2].mxu0 %vm144_vm2, %v3518_v54  ;;  %vm5008_vm2 = vcmp.eq.s32.totalorder %v4034_v30, %v3910_v51  ;;  %v5037_v30 = vld [vmem:[#allocation27_spill] sm:$0xff] }
 0x112   :  { %2874 = vmatprep.mubr.f32.mxu1 %v4998_v62  ;;  %3117 = vmatprep.mubr.msk.f32.mxu0 %vm145_vm5, %v3518_v54  ;;  %vm5014_vm5 = vcmp.eq.s32.totalorder %v4092_v16, %v3910_v51 }
 0x115   :  { %2875 = vmatmul.mubr.f32.gmra.mrb[2].mxu1 %v4999_v12  ;;  %3118 = vmatmul.mubr.msk.f32.gmra.mrb[4].mxu0 %vm146_vm4, %v3518_v54  ;;  %vm5012_vm4 = vcmp.eq.s32.totalorder %v4062_v6, %v3910_v51  ;;  %v5041_v6 = vld [vmem:[#allocation29_spill] sm:$0xff] }
 0x116   :  { %2877 = vmatprep.mubr.f32.mxu1 %v5000_v27  ;;  %3120 = vmatprep.mubr.msk.f32.mxu0 %vm147_vm7, %v3518_v54  ;;  %vm5018_vm7 = vcmp.eq.s32.totalorder %v4120_v50, %v3910_v51 }
 0x119   :  { %2878 = vmatmul.mubr.f32.gmra.mrb[4].mxu1 %v5001_v0  ;;  %3121 = vmatmul.mubr.msk.f32.gmra.mrb[6].mxu0 %vm148_vm6, %v3518_v54  ;;  %vm5016_vm6 = vcmp.eq.s32.totalorder %v4090_v57, %v3910_v51  ;;  %v5043_v57 = vld [vmem:[#allocation28_spill] sm:$0xff] }
 0x11a   :  { %2880 = vmatprep.mubr.f32.mxu1 %v5002_v3  ;;  %3123 = vmatprep.mubr.msk.f32.mxu0 %vm149_vm9, %v3518_v54  ;;  %vm5020_vm9 = vcmp.eq.s32.totalorder %v4118_v49, %v3910_v51 }
 0x11d   :  { %2881 = vmatmul.mubr.f32.gmra.mrb[6].mxu1 %v5003_v7  ;;  %3124 = vmatmul.mubr.msk.f32.gmra.mrb[8].mxu0 %vm5004_vm0, %v3518_v54  ;;  %vm5032_vm0 = vcmp.eq.s32.totalorder %v4202_v18, %v3910_v51 }
 0x11e   :  { %2883 = vmatprep.mubr.f32.mxu1 %v5005_v13  ;;  %3126 = vmatprep.mubr.msk.f32.mxu0 %vm5006_vm1, %v3518_v54  ;;  %vm5034_vm1 = vcmp.eq.s32.totalorder %v4231_v26, %v3910_v51 }
 0x121   :  { %2884 = vmatmul.mubr.f32.gmra.mrb[8].mxu1 %v5007_v28  ;;  %3127 = vmatmul.mubr.msk.f32.gmra.mrb[10].mxu0 %vm5008_vm2, %v3518_v54  ;;  %vm5036_vm2 = vcmp.eq.s32.totalorder %v4229_v58, %v3910_v51 }
 0x122   :  { %2886 = vmatprep.mubr.f32.mxu1 %v5009_v34  ;;  %3129 = vmatprep.mubr.msk.f32.mxu0 %vm5010_vm3, %v3518_v54  ;;  %vm5038_vm3 = vcmp.eq.s32.totalorder %v4255_v63, %v3910_v51 }
 0x125   :  { %2887 = vmatmul.mubr.f32.gmra.mrb[10].mxu1 %v5011_v47  ;;  %3130 = vmatmul.mubr.msk.f32.gmra.mrb[12].mxu0 %vm5012_vm4, %v3518_v54  ;;  %vm5040_vm4 = vcmp.eq.s32.totalorder %v4253_v4, %v3910_v51 }
 0x126   :  { %2889 = vmatprep.mubr.f32.mxu1 %v5013_v52  ;;  %3132 = vmatprep.mubr.msk.f32.mxu0 %vm5014_vm5, %v3518_v54  ;;  %vm5042_vm5 = vcmp.eq.s32.totalorder %v4988_v21, %v3910_v51 }
 0x129   :  { %2890 = vmatmul.mubr.f32.gmra.mrb[12].mxu1 %v5015_v41  ;;  %3133 = vmatmul.mubr.msk.f32.gmra.mrb[14].mxu0 %vm5016_vm6, %v3518_v54  ;;  %vm5044_vm6 = vcmp.eq.s32.totalorder %v4991_v22, %v3910_v51 }
 0x12a   :  { %2892 = vmatprep.mubr.f32.mxu1 %v5017_v8  ;;  %3135 = vmatprep.mubr.msk.f32.mxu0 %vm5018_vm7, %v3518_v54 }
 0x12d   :  { %2893 = vmatmul.mubr.f32.gmra.mrb[14].mxu1 %v5019_v9  ;;  %3136 = vmatmul.mubr.msk.f32.gmra.mrb[16].mxu0 %vm5020_vm9, %v3518_v54 }
 0x12e   :  { %2895 = vmatprep.mubr.f32.mxu1 %v5021_v23  ;;  %3138 = vmatprep.mubr.msk.f32.mxu0 %vm5022_vm8, %v3518_v54 }
 0x131   :  { %2896 = vmatmul.mubr.f32.gmra.mrb[16].mxu1 %v5023_v59  ;;  %3139 = vmatmul.mubr.msk.f32.gmra.mrb[18].mxu0 %vm5024_vm13, %v3518_v54 }
 0x132   :  { %2898 = vmatprep.mubr.f32.mxu1 %v5025_v60  ;;  %3141 = vmatprep.mubr.msk.f32.mxu0 %vm5026_vm11, %v3518_v54 }
 0x135   :  { %2899 = vmatmul.mubr.f32.gmra.mrb[18].mxu1 %v5027_v17  ;;  %3142 = vmatmul.mubr.msk.f32.gmra.mrb[20].mxu0 %vm5028_vm10, %v3518_v54 }
 0x136   :  { %2901 = vmatprep.mubr.f32.mxu1 %v5029_v33  ;;  %3144 = vmatprep.mubr.msk.f32.mxu0 %vm5030_vm12, %v3518_v54 }
 0x139   :  { %2902 = vmatmul.mubr.f32.gmra.mrb[20].mxu1 %v5031_v25  ;;  %3145 = vmatmul.mubr.msk.f32.gmra.mrb[22].mxu0 %vm5032_vm0, %v3518_v54 }
 0x13a   :  { %2904 = vmatprep.mubr.f32.mxu1 %v5033_v61  ;;  %3147 = vmatprep.mubr.msk.f32.mxu0 %vm5034_vm1, %v3518_v54 }
 0x13d   :  { %2905 = vmatmul.mubr.f32.gmra.mrb[22].mxu1 %v5035_v1  ;;  %3148 = vmatmul.mubr.msk.f32.gmra.mrb[24].mxu0 %vm5036_vm2, %v3518_v54 }
 0x13e   :  { %2907 = vmatprep.mubr.f32.mxu1 %v5037_v30  ;;  %3150 = vmatprep.mubr.msk.f32.mxu0 %vm5038_vm3, %v3518_v54 }
 0x141   :  { %2908 = vmatmul.mubr.f32.gmra.mrb[24].mxu1 %v5039_v24  ;;  %3151 = vmatmul.mubr.msk.f32.gmra.mrb[26].mxu0 %vm5040_vm4, %v3518_v54 }
 0x142   :  { %2910 = vmatprep.mubr.f32.mxu1 %v5041_v6  ;;  %3153 = vmatprep.mubr.msk.f32.mxu0 %vm5042_vm5, %v3518_v54 }
 0x145   :  { %2911 = vmatmul.mubr.f32.gmra.mrb[26].mxu1 %v5043_v57  ;;  %3154 = vmatmul.mubr.msk.f32.gmra.mrb[28].mxu0 %vm5044_vm6, %v3518_v54 }
 0x146   :  { %2913 = vmatprep.mubr.f32.mxu1 %v4298_v55  ;;  %3156 = vmatprep.mubr.msk.f32.mxu0 %vm171_vm15, %v3518_v54 }
 0x149   :  { %2914 = vmatmul.mubr.f32.gmra.mrb[28].mxu1 %v4296_v46  ;;  %3157 = vmatmul.mubr.msk.f32.gmra.mrb[30].mxu0 %vm172_vm14, %v3518_v54 }
 0x14a   :  { %2916 = vmatprep.mubr.f32.mxu1 %v4322_v40 }
 0x14d   :  { %2917 = vmatmul.mubr.f32.gmra.mrb[30].mxu1 %v4320_v53 }
 0x1e0   :  { %v3113_v16 = vpop.f32.mrb[0].mxu0 }
 0x1e1   :  { %v2037_v49 = vpop.f32.mrb[1].mxu0 }
 0x1e4   :  { %v2873_v50 = vpop.f32.mrb[0].mxu1  ;;  %v3116_v14 = vpop.f32.mrb[2].mxu0 }
 0x1e5   :  { %v3351_v42 = vadd.f32 %v3113_v16, %v2873_v50  ;;  %v1091_v56 = vpop.f32.mrb[1].mxu1  ;;  %v2049_v15 = vpop.f32.mrb[3].mxu0 }
 0x1e6   :  { %v3352_v4 = vadd.f32 %v2037_v49, %v1091_v56 }
 0x1e7   :  { %2228 = vst [vmem:[%s4874_s2 + $0x8] sm:$0xff] %v3351_v42 }
 0x1e8   :  { %2227 = vst [vmem:[%s4874_s2] sm:$0xff] %v3352_v4  ;;  %v2876_v51 = vpop.f32.mrb[2].mxu1  ;;  %v3119_v63 = vpop.f32.mrb[4].mxu0 }
 0x1e9   :  { %v3353_v18 = vadd.f32 %v3116_v14, %v2876_v51  ;;  %v1105_v5 = vpop.f32.mrb[3].mxu1  ;;  %v2061_v35 = vpop.f32.mrb[5].mxu0 }
 0x1ea   :  { %v3354_v58 = vadd.f32 %v2049_v15, %v1105_v5 }
 0x1eb   :  { %2230 = vst [vmem:[%s4874_s2 + $0x18] sm:$0xff] %v3353_v18 }
 0x1ec   :  { %2229 = vst [vmem:[%s4874_s2 + $0x10] sm:$0xff] %v3354_v58  ;;  %v2879_v26 = vpop.f32.mrb[4].mxu1  ;;  %v3122_v36 = vpop.f32.mrb[6].mxu0 }
 0x1ed   :  { %v3355_v19 = vadd.f32 %v3119_v63, %v2879_v26  ;;  %v1119_v38 = vpop.f32.mrb[5].mxu1  ;;  %v2073_v20 = vpop.f32.mrb[7].mxu0 }
 0x1ee   :  { %v3356_v46 = vadd.f32 %v2061_v35, %v1119_v38 }
 0x1ef   :  { %2232 = vst [vmem:[%s4874_s2 + $0x28] sm:$0xff] %v3355_v19 }
 0x1f0   :  { %2231 = vst [vmem:[%s4874_s2 + $0x20] sm:$0xff] %v3356_v46  ;;  %v2882_v55 = vpop.f32.mrb[6].mxu1  ;;  %v3125_v44 = vpop.f32.mrb[8].mxu0 }
 0x1f1   :  { %v3357_v10 = vadd.f32 %v3122_v36, %v2882_v55  ;;  %v1133_v53 = vpop.f32.mrb[7].mxu1  ;;  %v2085_v40 = vpop.f32.mrb[9].mxu0 }
 0x1f2   :  { %v3358_v37 = vadd.f32 %v2073_v20, %v1133_v53 }
 0x1f3   :  { %2234 = vst [vmem:[%s4874_s2 + $0x38] sm:$0xff] %v3357_v10 }
 0x1f4   :  { %2233 = vst [vmem:[%s4874_s2 + $0x30] sm:$0xff] %v3358_v37  ;;  %v2885_v11 = vpop.f32.mrb[8].mxu1  ;;  %v3128_v2 = vpop.f32.mrb[10].mxu0 }
 0x1f5   :  { %v3359_v45 = vadd.f32 %v3125_v44, %v2885_v11  ;;  %v1147_v31 = vpop.f32.mrb[9].mxu1  ;;  %v2097_v43 = vpop.f32.mrb[11].mxu0 }
 0x1f6   :  { %v3360_v54 = vadd.f32 %v2085_v40, %v1147_v31 }
 0x1f7   :  { %2236 = vst [vmem:[%s4874_s2 + $0x48] sm:$0xff] %v3359_v45 }
 0x1f8   :  { %2235 = vst [vmem:[%s4874_s2 + $0x40] sm:$0xff] %v3360_v54  ;;  %v2888_v32 = vpop.f32.mrb[10].mxu1  ;;  %v3131_v21 = vpop.f32.mrb[12].mxu0 }
 0x1f9   :  { %v3361_v22 = vadd.f32 %v3128_v2, %v2888_v32  ;;  %v1161_v29 = vpop.f32.mrb[11].mxu1  ;;  %v2109_v39 = vpop.f32.mrb[13].mxu0 }
 0x1fa   :  { %v3362_v48 = vadd.f32 %v2097_v43, %v1161_v29 }
 0x1fb   :  { %2238 = vst [vmem:[%s4874_s2 + $0x58] sm:$0xff] %v3361_v22 }
 0x1fc   :  { %2237 = vst [vmem:[%s4874_s2 + $0x50] sm:$0xff] %v3362_v48  ;;  %v2891_v62 = vpop.f32.mrb[12].mxu1  ;;  %v3134_v12 = vpop.f32.mrb[14].mxu0 }
 0x1fd   :  { %v3363_v27 = vadd.f32 %v3131_v21, %v2891_v62  ;;  %v1175_v0 = vpop.f32.mrb[13].mxu1  ;;  %v2121_v3 = vpop.f32.mrb[15].mxu0 }
 0x1fe   :  { %v3364_v7 = vadd.f32 %v2109_v39, %v1175_v0 }
 0x1ff   :  { %2240 = vst [vmem:[%s4874_s2 + $0x68] sm:$0xff] %v3363_v27 }
 0x200   :  { %2239 = vst [vmem:[%s4874_s2 + $0x60] sm:$0xff] %v3364_v7  ;;  %v2894_v13 = vpop.f32.mrb[14].mxu1  ;;  %v3137_v28 = vpop.f32.mrb[16].mxu0 }
 0x201   :  { %v3365_v34 = vadd.f32 %v3134_v12, %v2894_v13  ;;  %v1189_v47 = vpop.f32.mrb[15].mxu1  ;;  %v2133_v52 = vpop.f32.mrb[17].mxu0 }
 0x202   :  { %v3366_v41 = vadd.f32 %v2121_v3, %v1189_v47 }
 0x203   :  { %2242 = vst [vmem:[%s4874_s2 + $0x78] sm:$0xff] %v3365_v34 }
 0x204   :  { %2241 = vst [vmem:[%s4874_s2 + $0x70] sm:$0xff] %v3366_v41  ;;  %v2897_v8 = vpop.f32.mrb[16].mxu1  ;;  %v3140_v9 = vpop.f32.mrb[18].mxu0 }
 0x205   :  { %v3367_v23 = vadd.f32 %v3137_v28, %v2897_v8  ;;  %v1203_v59 = vpop.f32.mrb[17].mxu1  ;;  %v2145_v60 = vpop.f32.mrb[19].mxu0 }
 0x206   :  { %v3368_v17 = vadd.f32 %v2133_v52, %v1203_v59 }
 0x207   :  { %2244 = vst [vmem:[%s4874_s2 + $0x88] sm:$0xff] %v3367_v23 }
 0x208   :  { %2243 = vst [vmem:[%s4874_s2 + $0x80] sm:$0xff] %v3368_v17  ;;  %v2900_v33 = vpop.f32.mrb[18].mxu1  ;;  %v3143_v25 = vpop.f32.mrb[20].mxu0 }
 0x209   :  { %v3369_v61 = vadd.f32 %v3140_v9, %v2900_v33  ;;  %v1217_v1 = vpop.f32.mrb[19].mxu1  ;;  %v2157_v30 = vpop.f32.mrb[21].mxu0 }
 0x20a   :  { %v3370_v24 = vadd.f32 %v2145_v60, %v1217_v1 }
 0x20b   :  { %2246 = vst [vmem:[%s4874_s2 + $0x98] sm:$0xff] %v3369_v61 }
 0x20c   :  { %2245 = vst [vmem:[%s4874_s2 + $0x90] sm:$0xff] %v3370_v24  ;;  %v2903_v6 = vpop.f32.mrb[20].mxu1  ;;  %v3146_v57 = vpop.f32.mrb[22].mxu0 }
 0x20d   :  { %v3371_v16 = vadd.f32 %v3143_v25, %v2903_v6  ;;  %v1231_v49 = vpop.f32.mrb[21].mxu1  ;;  %v2169_v50 = vpop.f32.mrb[23].mxu0 }
 0x20e   :  { %v3372_v14 = vadd.f32 %v2157_v30, %v1231_v49 }
 0x20f   :  { %2248 = vst [vmem:[%s4874_s2 + $0xa8] sm:$0xff] %v3371_v16 }
 0x210   :  { %2247 = vst [vmem:[%s4874_s2 + $0xa0] sm:$0xff] %v3372_v14  ;;  %v2906_v42 = vpop.f32.mrb[22].mxu1  ;;  %v3149_v56 = vpop.f32.mrb[24].mxu0 }
 0x211   :  { %v3373_v15 = vadd.f32 %v3146_v57, %v2906_v42  ;;  %v1245_v4 = vpop.f32.mrb[23].mxu1  ;;  %v2181_v51 = vpop.f32.mrb[25].mxu0 }
 0x212   :  { %v3374_v63 = vadd.f32 %v2169_v50, %v1245_v4 }
 0x213   :  { %2250 = vst [vmem:[%s4874_s2 + $0xb8] sm:$0xff] %v3373_v15 }
 0x214   :  { %2249 = vst [vmem:[%s4874_s2 + $0xb0] sm:$0xff] %v3374_v63  ;;  %v2909_v18 = vpop.f32.mrb[24].mxu1  ;;  %v3152_v5 = vpop.f32.mrb[26].mxu0 }
 0x215   :  { %v3375_v35 = vadd.f32 %v3149_v56, %v2909_v18  ;;  %v1259_v58 = vpop.f32.mrb[25].mxu1  ;;  %v2193_v26 = vpop.f32.mrb[27].mxu0 }
 0x216   :  { %v3376_v36 = vadd.f32 %v2181_v51, %v1259_v58 }
 0x217   :  { %2252 = vst [vmem:[%s4874_s2 + $0xc8] sm:$0xff] %v3375_v35 }
 0x218   :  { %2251 = vst [vmem:[%s4874_s2 + $0xc0] sm:$0xff] %v3376_v36  ;;  %v2912_v19 = vpop.f32.mrb[26].mxu1  ;;  %v3155_v38 = vpop.f32.mrb[28].mxu0 }
 0x219   :  { %v3377_v20 = vadd.f32 %v3152_v5, %v2912_v19  ;;  %v1273_v46 = vpop.f32.mrb[27].mxu1  ;;  %v2205_v55 = vpop.f32.mrb[29].mxu0 }
 0x21a   :  { %v3378_v44 = vadd.f32 %v2193_v26, %v1273_v46 }
 0x21b   :  { %2254 = vst [vmem:[%s4874_s2 + $0xd8] sm:$0xff] %v3377_v20 }
 0x21c   :  { %2253 = vst [vmem:[%s4874_s2 + $0xd0] sm:$0xff] %v3378_v44  ;;  %v2915_v10 = vpop.f32.mrb[28].mxu1  ;;  %v3158_v53 = vpop.f32.mrb[30].mxu0 }
 0x21d   :  { %v3379_v40 = vadd.f32 %v3155_v38, %v2915_v10  ;;  %v1287_v37 = vpop.f32.mrb[29].mxu1  ;;  %v2217_v11 = vpop.f32.mrb[31].mxu0 }
 0x21e   :  { %v3380_v2 = vadd.f32 %v2205_v55, %v1287_v37 }
 0x21f   :  { %2256 = vst [vmem:[%s4874_s2 + $0xe8] sm:$0xff] %v3379_v40 }
 0x220   :  { %2255 = vst [vmem:[%s4874_s2 + $0xe0] sm:$0xff] %v3380_v2  ;;  %v2918_v45 = vpop.f32.mrb[30].mxu1 }
 0x221   :  { %v3381_v31 = vadd.f32 %v3158_v53, %v2918_v45  ;;  %v1301_v43 = vpop.f32.mrb[31].mxu1 }
 0x222   :  { %v3382_v54 = vadd.f32 %v2217_v11, %v1301_v43 }
 0x223   :  { %2258 = vst [vmem:[%s4874_s2 + $0xf8] sm:$0xff] %v3381_v31 }
 0x224   :  { %2257 = vst [vmem:[%s4874_s2 + $0xf0] sm:$0xff] %v3382_v54 }

</bundles_post_ra>
